<compile_context>
chip_gen: v7x
topology: tpu7x:2x2x1
jax: 0.10.0
libtpu: 0.0.40
codegen_flags: <defaults>
</compile_context>

<pallas_src>
import functools

import jax
import jax.numpy as jnp
from jax import lax
from jax.experimental import pallas as pl
from jax.experimental.pallas import tpu as pltpu


_LANE = 128
_VMEM_LIMIT_BYTES = 48 * 1024 * 1024      # fits v5e/v6e (128 MiB) and v7x (64 MiB)
_STRIP_BUDGET_BYTES = 16 * 1024 * 1024    # per-strip working-set target


def _round_up(x, m):
    return (x + m - 1) // m * m


def _pad_last(a, size):
    pad = size - a.shape[-1]
    if pad == 0:
        return a
    cfg = [(0, 0)] * (a.ndim - 1) + [(0, pad)]
    return jnp.pad(a, cfg)


def _choose_strip_h(h, w, cin_p, cout_p, itemsize):
    """Largest divisor of h whose per-strip working set fits the VMEM budget."""
    best = 1
    for sh in range(1, h + 1):
        if h % sh:
            continue
        patches = sh * w * 9 * cin_p * itemsize          # im2col operand
        xin = 2 * sh * w * cin_p * itemsize              # double-buffered input block
        halo = 2 * 2 * w * cin_p * itemsize              # two 1-row halo blocks (x2 buf)
        xout = 2 * sh * w * cout_p * itemsize            # double-buffered output block
        acc = 2 * sh * w * cout_p * 4                    # f32 matmul result + stat temps
        xpad = (sh + 2) * (w + 2) * cin_p * itemsize     # halo scratch
        weights = 2 * 9 * cin_p * cout_p * itemsize
        if patches + xin + halo + xout + acc + xpad + weights <= _STRIP_BUDGET_BYTES:
            best = sh
    return best


# --------------------------------------------------------------------------------------
# Fused 3x3 SAME conv kernel, grid = (N, H/strip).
#   - optionally applies the previous layer's BatchNorm scale/shift + ReLU to the input
#     as it is read (fuse_input_bn=True for conv2);
#   - strip-sized zero-bordered VMEM scratch holds the SAME-padding halo;
#   - one im2col matmul on the MXU per step (compute_dtype operands, f32 accumulate);
#   - per-channel sum / sum-of-squares accumulated per batch element (megacore-safe).
# --------------------------------------------------------------------------------------
def _conv3x3_kernel(*refs, SH, W, cin_p, cout_p, fuse_input_bn, compute_dtype):
    if fuse_input_bn:
        (x_ref, xtop_ref, xbot_ref, w_ref, b_ref, sc_ref, sf_ref,
         y_ref, sum_ref, sq_ref, xpad_ref) = refs
    else:
        (x_ref, xtop_ref, xbot_ref, w_ref, b_ref,
         y_ref, sum_ref, sq_ref, xpad_ref) = refs
        sc_ref = sf_ref = None

    s = pl.program_id(1)
    is_first = s == 0
    is_last = s == pl.num_programs(1) - 1

    def prep(ref):
        v = ref[0]                                              # (rows, W, cin_p)
        if fuse_input_bn:
            v = jnp.maximum(v.astype(jnp.float32) * sc_ref[...] + sf_ref[...], 0.0)
        return v.astype(compute_dtype)                          # no-op if dtypes match

    main = prep(x_ref)                                          # (SH, W, cin_p)
    top = prep(xtop_ref)                                        # (1,  W, cin_p)
    bot = prep(xbot_ref)                                        # (1,  W, cin_p)
    top = jnp.where(is_first, jnp.zeros_like(top), top)         # zero-pad image boundary
    bot = jnp.where(is_last, jnp.zeros_like(bot), bot)

    # SAME-padding halo lives in a strip-sized VMEM scratch.  Only the two 1-wide
    # border columns are zeroed each step (cheap, megacore-safe); halo rows and the
    # interior are fully rewritten every step -> no cross-step invariants.
    zcol = jnp.zeros((SH + 2, 1, cin_p), compute_dtype)
    xpad_ref[:, 0:1, :] = zcol
    xpad_ref[:, W + 1:W + 2, :] = zcol
    xpad_ref[0:1, pl.ds(1, W), :] = top
    xpad_ref[pl.ds(1, SH), pl.ds(1, W), :] = main
    xpad_ref[SH + 1:SH + 2, pl.ds(1, W), :] = bot

    # im2col: 9 shifted windows -> ONE MXU matmul (f32 accumulate) + bias epilogue.
    # TODO(synk): the three dx taps are sublane-offset slices; pltpu.roll on a single
    # slab would move that relayout to the (idle) XLU slot.
    taps = [xpad_ref[pl.ds(dy, SH), pl.ds(dx, W), :]
            for dy in range(3) for dx in range(3)]              # 9 x (SH, W, cin_p)
    patches = jnp.concatenate(taps, axis=-1).reshape(SH * W, 9 * cin_p)
    acc = jnp.dot(patches, w_ref[...], preferred_element_type=jnp.float32)
    acc = acc + b_ref[...]                                      # (1, cout_p) broadcast

    y_store = acc.astype(y_ref.dtype)
    y_ref[0] = y_store.reshape(SH, W, cout_p)

    # BatchNorm batch statistics, computed from the values exactly as stored
    # (post-cast), accumulated per batch element (disjoint blocks across the
    # parallel grid axis -> safe under megacore).
    stat = y_store.astype(jnp.float32)

    @pl.when(is_first)
    def _init():
        sum_ref[...] = jnp.zeros_like(sum_ref)
        sq_ref[...] = jnp.zeros_like(sq_ref)

    psum = jnp.sum(stat, axis=0, keepdims=True)                 # (1, cout_p)
    psq = jnp.sum(stat * stat, axis=0, keepdims=True)
    sum_ref[...] += jnp.broadcast_to(psum.reshape(1, 1, cout_p), sum_ref.shape)
    sq_ref[...] += jnp.broadcast_to(psq.reshape(1, 1, cout_p), sq_ref.shape)


def conv3x3_bn_stats(x, w_hwio, b, in_scale=None, in_shift=None,
                     compute_dtype=jnp.bfloat16):
    """3x3 SAME conv + bias on a channel-padded NHWC input.

    Returns (y, sum, sumsq); stats are per-batch-element partials of shape
    (N, 8, Cout_p) f32 (row 0 of the middle axis is meaningful, rows are identical).
    If in_scale / in_shift are given, relu(x * in_scale + in_shift) is applied to the
    input inside the kernel, fusing the previous layer's BatchNorm + ReLU.
    """
    n, h, w, cin_p = x.shape
    kh, kw, cin, cout = w_hwio.shape
    assert (kh, kw) == (3, 3) and cin <= cin_p
    cout_p = _round_up(cout, _LANE)
    fuse = in_scale is not None

    # im2col weight layout, zero-padded to lane-aligned (9*cin_p, cout_p).
    wp = jnp.zeros((3, 3, cin_p, cout_p), compute_dtype)
    wp = wp.at[:, :, :cin, :cout].set(w_hwio.astype(compute_dtype))
    w2d = wp.reshape(9 * cin_p, cout_p)
    b2d = jnp.zeros((1, cout_p), jnp.float32).at[0, :cout].set(b.astype(jnp.float32))

    itemsize = jnp.dtype(compute_dtype).itemsize
    sh = _choose_strip_h(h, w, cin_p, cout_p, itemsize)
    n_strips = h // sh

    kernel = functools.partial(_conv3x3_kernel, SH=sh, W=w, cin_p=cin_p,
                               cout_p=cout_p, fuse_input_bn=fuse,
                               compute_dtype=compute_dtype)

    in_specs = [
        # main strip: rows [s*sh, s*sh + sh)
        pl.BlockSpec((1, sh, w, cin_p), lambda i, j: (i, j, 0, 0)),
        # 1-row top / bottom halo (index clamped at the image boundary; the boundary
        # case is zeroed inside the kernel).
        pl.BlockSpec((1, 1, w, cin_p),
                     lambda i, j: (i, jnp.maximum(j * sh - 1, 0), 0, 0)),
        pl.BlockSpec((1, 1, w, cin_p),
                     lambda i, j: (i, jnp.minimum((j + 1) * sh, h - 1), 0, 0)),
        # TODO(synk): weights/bias/scale/shift use constant index maps; pl.Buffered(1)
        # would drop their second pipeline buffer (matters on v7x's 64 MiB VMEM).
        pl.BlockSpec((9 * cin_p, cout_p), lambda i, j: (0, 0)),
        pl.BlockSpec((1, cout_p), lambda i, j: (0, 0)),
    ]
    args = [x, x, x, w2d, b2d]
    if fuse:
        in_specs += [pl.BlockSpec((1, cin_p), lambda i, j: (0, 0)),
                     pl.BlockSpec((1, cin_p), lambda i, j: (0, 0))]
        args += [in_scale.astype(jnp.float32), in_shift.astype(jnp.float32)]

    y, ssum, ssq = pl.pallas_call(
        kernel,
        out_shape=(
            jax.ShapeDtypeStruct((n, h, w, cout_p), compute_dtype),
            jax.ShapeDtypeStruct((n, 8, cout_p), jnp.float32),
            jax.ShapeDtypeStruct((n, 8, cout_p), jnp.float32),
        ),
        grid=(n, n_strips),
        in_specs=in_specs,
        out_specs=(
            pl.BlockSpec((1, sh, w, cout_p), lambda i, j: (i, j, 0, 0)),
            pl.BlockSpec((1, 8, cout_p), lambda i, j: (i, 0, 0)),  # per-n accumulator
            pl.BlockSpec((1, 8, cout_p), lambda i, j: (i, 0, 0)),
        ),
        scratch_shapes=[pltpu.VMEM((sh + 2, w + 2, cin_p), compute_dtype)],
        compiler_params=pltpu.CompilerParams(
            dimension_semantics=("parallel", "arbitrary"),
            vmem_limit_bytes=_VMEM_LIMIT_BYTES),
    )(*args)
    return y, ssum, ssq


# --------------------------------------------------------------------------------------
# Final BatchNorm(affine) + ReLU elementwise kernel, strip-tiled, fully parallel grid.
# --------------------------------------------------------------------------------------
def _bn_relu_kernel(y_ref, scale_ref, shift_ref, o_ref):
    y = y_ref[...].astype(jnp.float32)
    o_ref[...] = jnp.maximum(y * scale_ref[...] + shift_ref[...], 0.0
                             ).astype(o_ref.dtype)


def bn_relu(y, scale, shift):
    n, h, w, cp = y.shape
    itemsize = jnp.dtype(y.dtype).itemsize
    sh = 1
    for cand in range(1, h + 1):
        if h % cand == 0 and 2 * cand * w * cp * (itemsize + 4) <= _STRIP_BUDGET_BYTES:
            sh = cand
    n_strips = h // sh
    return pl.pallas_call(
        _bn_relu_kernel,
        out_shape=jax.ShapeDtypeStruct((n, h, w, cp), jnp.float32),
        grid=(n, n_strips),
        in_specs=[pl.BlockSpec((1, sh, w, cp), lambda i, j: (i, j, 0, 0)),
                  pl.BlockSpec((1, cp), lambda i, j: (0, 0)),
                  pl.BlockSpec((1, cp), lambda i, j: (0, 0))],
        out_specs=pl.BlockSpec((1, sh, w, cp), lambda i, j: (i, j, 0, 0)),
        compiler_params=pltpu.CompilerParams(
            dimension_semantics=("parallel", "parallel"),
            vmem_limit_bytes=_VMEM_LIMIT_BYTES),
    )(y, scale, shift)


# --------------------------------------------------------------------------------------
# BatchNorm scale/shift from the accumulated batch statistics (tiny, plain JAX).
# --------------------------------------------------------------------------------------
def _bn_scale_shift(ssum, ssq, count, gamma_p, beta_p, eps):
    # TODO(synk): single-pass E[x^2]-E[x]^2 can cancel badly at production scale;
    # switch to a shifted / Welford-style combine of the per-strip partials.
    s = jnp.sum(ssum[:, 0, :], axis=0)                          # (cout_p,)
    q = jnp.sum(ssq[:, 0, :], axis=0)
    mean = s / count
    var = jnp.maximum(q / count - mean * mean, 0.0)
    scale = gamma_p * lax.rsqrt(var + eps)
    shift = beta_p - mean * scale
    return scale.reshape(1, -1), shift.reshape(1, -1)


# --------------------------------------------------------------------------------------
# Full UnetDownModule forward.
# --------------------------------------------------------------------------------------
def unet_down_forward(x_nchw, params, downsample=True, eps=1e-5,
                      compute_dtype=jnp.bfloat16):
    # NCHW -> NHWC.  The 2x2 max-pool, the channel lane-padding and the compute-dtype
    # cast are all folded into this single XLA boundary pass (no extra Pallas launch,
    # no in-kernel f32 round trip for conv1).
    x = jnp.transpose(x_nchw, (0, 2, 3, 1))
    if downsample:
        n, h, w, c = x.shape
        x = jnp.max(x.reshape(n, h // 2, 2, w // 2, 2, c), axis=(2, 4))
    n, h, w, cin = x.shape
    cin_p = _round_up(cin, _LANE)
    x = _pad_last(x, cin_p).astype(compute_dtype)

    cout1 = params["w1"].shape[-1]
    cout1_p = _round_up(cout1, _LANE)
    g1 = _pad_last(params["g1"].astype(jnp.float32), cout1_p)
    t1 = _pad_last(params["bt1"].astype(jnp.float32), cout1_p)

    # conv1 (+ per-batch-element partial batch stats)
    y1, s1, q1 = conv3x3_bn_stats(x, params["w1"], params["b1"],
                                  compute_dtype=compute_dtype)
    scale1, shift1 = _bn_scale_shift(s1, q1, float(n * h * w), g1, t1, eps)

    cout2 = params["w2"].shape[-1]
    cout2_p = _round_up(cout2, _LANE)
    g2 = _pad_last(params["g2"].astype(jnp.float32), cout2_p)
    t2 = _pad_last(params["bt2"].astype(jnp.float32), cout2_p)

    # conv2: BN1 + ReLU fused into the input load path (+ batch stats)
    y2, s2, q2 = conv3x3_bn_stats(y1, params["w2"], params["b2"],
                                  in_scale=scale1, in_shift=shift1,
                                  compute_dtype=compute_dtype)
    scale2, shift2 = _bn_scale_shift(s2, q2, float(n * h * w), g2, t2, eps)

    # final BN2 + ReLU
    out = bn_relu(y2, scale2, shift2)                            # (N, H, W, cout2_p) f32
    out = out[..., :cout2]
    # TODO(synk): the final NHWC->NCHW transpose stays an XLA pass (one extra HBM
    # round trip); an in-kernel fused transpose needs a Mosaic-supported minor-dim
    # transpose of the (H, W, C) slab.
    return jnp.transpose(out, (0, 3, 1, 2))

# TODO(synk): BatchNorm running_mean/running_var buffer updates (training bookkeeping,
# they do not affect the returned activation) are not materialized.


# --------------------------------------------------------------------------------------
# Pure-JAX (f32) reference for the correctness check.
# --------------------------------------------------------------------------------------
def reference_forward(x_nchw, params, downsample=True, eps=1e-5):
    x = jnp.transpose(x_nchw, (0, 2, 3, 1))
    if downsample:
        n, h, w, c = x.shape
        x = jnp.max(x.reshape(n, h // 2, 2, w // 2, 2, c), axis=(2, 4))

    def block(x, w, b, gamma, beta):
        y = lax.conv_general_dilated(
            x, w, window_strides=(1, 1), padding="SAME",
            dimension_numbers=("NHWC", "HWIO", "NHWC")) + b
        mean = jnp.mean(y, axis=(0, 1, 2))
        var = jnp.mean((y - mean) ** 2, axis=(0, 1, 2))
        y = (y - mean) / jnp.sqrt(var + eps) * gamma + beta
        return jnp.maximum(y, 0.0)

    x = block(x, params["w1"], params["b1"], params["g1"], params["bt1"])
    x = block(x, params["w2"], params["b2"], params["g2"], params["bt2"])
    return jnp.transpose(x, (0, 3, 1, 2))


if __name__ == "__main__":
    key = jax.random.PRNGKey(0)
    in_ch, out_ch = 4, 8
    N, H, W = 2, 16, 16

    ks = jax.random.split(key, 9)
    params = {
        "w1": 0.2 * jax.random.normal(ks[0], (3, 3, in_ch, out_ch), jnp.float32),
        "b1": 0.1 * jax.random.normal(ks[1], (out_ch,), jnp.float32),
        "g1": 1.0 + 0.1 * jax.random.normal(ks[2], (out_ch,), jnp.float32),
        "bt1": 0.1 * jax.random.normal(ks[3], (out_ch,), jnp.float32),
        "w2": 0.2 * jax.random.normal(ks[4], (3, 3, out_ch, out_ch), jnp.float32),
        "b2": 0.1 * jax.random.normal(ks[5], (out_ch,), jnp.float32),
        "g2": 1.0 + 0.1 * jax.random.normal(ks[6], (out_ch,), jnp.float32),
        "bt2": 0.1 * jax.random.normal(ks[7], (out_ch,), jnp.float32),
    }
    x = jax.random.normal(ks[8], (N, in_ch, H, W), jnp.float32)   # NCHW, like PyTorch

    ref = reference_forward(x, params, downsample=True)

    # f32 MXU path: tight numerical check of the kernel logic.
    out_f32 = unet_down_forward(x, params, downsample=True, compute_dtype=jnp.float32)
    out_f32 = jax.block_until_ready(out_f32)
    assert out_f32.shape == (N, out_ch, H // 2, W // 2), out_f32.shape
    err_f32 = float(jnp.max(jnp.abs(out_f32 - ref)))
    assert err_f32 < 5e-3, f"f32 path max abs error {err_f32}"

    # bf16 MXU path (performance configuration): BN1 stats are now computed from the
    # bf16-stored intermediate itself, but two BN-normalized bf16 layers still warrant
    # a loose tolerance.
    out_bf16 = unet_down_forward(x, params, downsample=True, compute_dtype=jnp.bfloat16)
    out_bf16 = jax.block_until_ready(out_bf16)
    assert out_bf16.shape == (N, out_ch, H // 2, W // 2), out_bf16.shape
    err_bf16 = float(jnp.max(jnp.abs(out_bf16 - ref)))
    assert err_bf16 < 1.5e-1, f"bf16 path max abs error {err_bf16}"

    print("KERNEL_OK")
</pallas_src>

<mosaic_0001>
module attributes {stable_mosaic.version = 11 : i64} {
  func.func @_conv3x3_kernel(%arg0: i32, %arg1: i32, %arg2: memref<1x8x8x128xf32, #tpu.memory_space<vmem>>, %arg3: memref<1x1x8x128xf32, #tpu.memory_space<vmem>>, %arg4: memref<1x1x8x128xf32, #tpu.memory_space<vmem>>, %arg5: memref<1152x128xf32, #tpu.memory_space<vmem>>, %arg6: memref<1x128xf32, #tpu.memory_space<vmem>>, %arg7: memref<1x8x8x128xf32, #tpu.memory_space<vmem>>, %arg8: memref<1x8x128xf32, #tpu.memory_space<vmem>>, %arg9: memref<1x8x128xf32, #tpu.memory_space<vmem>>, %arg10: memref<10x10x128xf32, #tpu.memory_space<vmem>>) attributes {dimension_semantics = [#tpu.dimension_semantics<parallel>, #tpu.dimension_semantics<arbitrary>], iteration_bounds = array<i64: 2, 1>, scalar_prefetch = 0 : i64, scratch_operands = 1 : i64, tpu.core_type = #tpu.core_type<tc>, window_params = [{transform_indices = @transform_0, window_bounds = array<i64: 1, 8, 8, 128>}, {transform_indices = @transform_1, window_bounds = array<i64: 1, 1, 8, 128>}, {transform_indices = @transform_2, window_bounds = array<i64: 1, 1, 8, 128>}, {pipeline_mode = #tpu.pipeline_mode<synchronous>, transform_indices = @transform_3, window_bounds = array<i64: 1152, 128>}, {pipeline_mode = #tpu.pipeline_mode<synchronous>, transform_indices = @transform_4, window_bounds = array<i64: 1, 128>}, {transform_indices = @transform_5, window_bounds = array<i64: 1, 8, 8, 128>}, {transform_indices = @transform_6, window_bounds = array<i64: 1, 8, 128>}, {transform_indices = @transform_7, window_bounds = array<i64: 1, 8, 128>}]} {
    %c0_i32 = arith.constant 0 : i32
    %0 = arith.cmpi eq, %arg1, %c0_i32 : i32
    %c0_i32_0 = arith.constant 0 : i32
    %1 = arith.cmpi eq, %arg1, %c0_i32_0 : i32
    %c0 = arith.constant 0 : index
    %c0_1 = arith.constant 0 : index
    %c0_2 = arith.constant 0 : index
    %c0_3 = arith.constant 0 : index
    %2 = vector.load %arg2[%c0, %c0_1, %c0_2, %c0_3] : memref<1x8x8x128xf32, #tpu.memory_space<vmem>>, vector<1x8x8x128xf32>
    %3 = vector.shape_cast %2 : vector<1x8x8x128xf32> to vector<8x8x128xf32>
    %c0_4 = arith.constant 0 : index
    %c0_5 = arith.constant 0 : index
    %c0_6 = arith.constant 0 : index
    %c0_7 = arith.constant 0 : index
    %4 = vector.load %arg3[%c0_4, %c0_5, %c0_6, %c0_7] : memref<1x1x8x128xf32, #tpu.memory_space<vmem>>, vector<1x1x8x128xf32>
    %5 = vector.shape_cast %4 : vector<1x1x8x128xf32> to vector<1x8x128xf32>
    %c0_8 = arith.constant 0 : index
    %c0_9 = arith.constant 0 : index
    %c0_10 = arith.constant 0 : index
    %c0_11 = arith.constant 0 : index
    %6 = vector.load %arg4[%c0_8, %c0_9, %c0_10, %c0_11] : memref<1x1x8x128xf32, #tpu.memory_space<vmem>>, vector<1x1x8x128xf32>
    %7 = vector.shape_cast %6 : vector<1x1x8x128xf32> to vector<1x8x128xf32>
    %cst = arith.constant 0.000000e+00 : f32
    %8 = vector.broadcast %cst : f32 to vector<1x8x128xf32>
    %9 = arith.select %0, %8, %5 : vector<1x8x128xf32>
    %cst_12 = arith.constant 0.000000e+00 : f32
    %10 = vector.broadcast %cst_12 : f32 to vector<1x8x128xf32>
    %11 = arith.select %1, %10, %7 : vector<1x8x128xf32>
    %cst_13 = arith.constant 0.000000e+00 : f32
    %12 = vector.broadcast %cst_13 : f32 to vector<10x1x128xf32>
    %c0_14 = arith.constant 0 : index
    %c0_15 = arith.constant 0 : index
    %c0_16 = arith.constant 0 : index
    %13 = vector.load %arg10[%c0_14, %c0_15, %c0_16] : memref<10x10x128xf32, #tpu.memory_space<vmem>>, vector<10x1x128xf32>
    tpu.vector_store %arg10[%c0_14, %c0_15, %c0_16], %12 {strides = array<i32>} : memref<10x10x128xf32, #tpu.memory_space<vmem>>, vector<10x1x128xf32>,
    %c0_17 = arith.constant 0 : index
    %c9 = arith.constant 9 : index
    %c0_18 = arith.constant 0 : index
    %14 = vector.load %arg10[%c0_17, %c9, %c0_18] : memref<10x10x128xf32, #tpu.memory_space<vmem>>, vector<10x1x128xf32>
    tpu.vector_store %arg10[%c0_17, %c9, %c0_18], %12 {strides = array<i32>} : memref<10x10x128xf32, #tpu.memory_space<vmem>>, vector<10x1x128xf32>,
    %c0_19 = arith.constant 0 : index
    %c1 = arith.constant 1 : index
    %c0_20 = arith.constant 0 : index
    %15 = vector.load %arg10[%c0_19, %c1, %c0_20] : memref<10x10x128xf32, #tpu.memory_space<vmem>>, vector<1x8x128xf32>
    tpu.vector_store %arg10[%c0_19, %c1, %c0_20], %9 {strides = array<i32>} : memref<10x10x128xf32, #tpu.memory_space<vmem>>, vector<1x8x128xf32>,
    %c1_21 = arith.constant 1 : index
    %c1_22 = arith.constant 1 : index
    %c0_23 = arith.constant 0 : index
    %16 = vector.load %arg10[%c1_21, %c1_22, %c0_23] : memref<10x10x128xf32, #tpu.memory_space<vmem>>, vector<8x8x128xf32>
    tpu.vector_store %arg10[%c1_21, %c1_22, %c0_23], %3 {strides = array<i32>} : memref<10x10x128xf32, #tpu.memory_space<vmem>>, vector<8x8x128xf32>,
    %c9_24 = arith.constant 9 : index
    %c1_25 = arith.constant 1 : index
    %c0_26 = arith.constant 0 : index
    %17 = vector.load %arg10[%c9_24, %c1_25, %c0_26] : memref<10x10x128xf32, #tpu.memory_space<vmem>>, vector<1x8x128xf32>
    tpu.vector_store %arg10[%c9_24, %c1_25, %c0_26], %11 {strides = array<i32>} : memref<10x10x128xf32, #tpu.memory_space<vmem>>, vector<1x8x128xf32>,
    %c0_27 = arith.constant 0 : index
    %c0_28 = arith.constant 0 : index
    %c0_29 = arith.constant 0 : index
    %18 = vector.load %arg10[%c0_27, %c0_28, %c0_29] : memref<10x10x128xf32, #tpu.memory_space<vmem>>, vector<8x8x128xf32>
    %c0_30 = arith.constant 0 : index
    %c1_31 = arith.constant 1 : index
    %c0_32 = arith.constant 0 : index
    %19 = vector.load %arg10[%c0_30, %c1_31, %c0_32] : memref<10x10x128xf32, #tpu.memory_space<vmem>>, vector<8x8x128xf32>
    %c0_33 = arith.constant 0 : index
    %c2 = arith.constant 2 : index
    %c0_34 = arith.constant 0 : index
    %20 = vector.load %arg10[%c0_33, %c2, %c0_34] : memref<10x10x128xf32, #tpu.memory_space<vmem>>, vector<8x8x128xf32>
    %c1_35 = arith.constant 1 : index
    %c0_36 = arith.constant 0 : index
    %c0_37 = arith.constant 0 : index
    %21 = vector.load %arg10[%c1_35, %c0_36, %c0_37] : memref<10x10x128xf32, #tpu.memory_space<vmem>>, vector<8x8x128xf32>
    %c1_38 = arith.constant 1 : index
    %c1_39 = arith.constant 1 : index
    %c0_40 = arith.constant 0 : index
    %22 = vector.load %arg10[%c1_38, %c1_39, %c0_40] : memref<10x10x128xf32, #tpu.memory_space<vmem>>, vector<8x8x128xf32>
    %c1_41 = arith.constant 1 : index
    %c2_42 = arith.constant 2 : index
    %c0_43 = arith.constant 0 : index
    %23 = vector.load %arg10[%c1_41, %c2_42, %c0_43] : memref<10x10x128xf32, #tpu.memory_space<vmem>>, vector<8x8x128xf32>
    %c2_44 = arith.constant 2 : index
    %c0_45 = arith.constant 0 : index
    %c0_46 = arith.constant 0 : index
    %24 = vector.load %arg10[%c2_44, %c0_45, %c0_46] : memref<10x10x128xf32, #tpu.memory_space<vmem>>, vector<8x8x128xf32>
    %c2_47 = arith.constant 2 : index
    %c1_48 = arith.constant 1 : index
    %c0_49 = arith.constant 0 : index
    %25 = vector.load %arg10[%c2_47, %c1_48, %c0_49] : memref<10x10x128xf32, #tpu.memory_space<vmem>>, vector<8x8x128xf32>
    %c2_50 = arith.constant 2 : index
    %c2_51 = arith.constant 2 : index
    %c0_52 = arith.constant 0 : index
    %26 = vector.load %arg10[%c2_50, %c2_51, %c0_52] : memref<10x10x128xf32, #tpu.memory_space<vmem>>, vector<8x8x128xf32>
    %27 = tpu.concatenate %18, %19, %20, %21, %22, %23, %24, %25, %26 in 2 : vector<8x8x128xf32>, vector<8x8x128xf32>, vector<8x8x128xf32>, vector<8x8x128xf32>, vector<8x8x128xf32>, vector<8x8x128xf32>, vector<8x8x128xf32>, vector<8x8x128xf32>, vector<8x8x128xf32> -> vector<8x8x1152xf32>
    %28 = vector.shape_cast %27 : vector<8x8x1152xf32> to vector<64x1152xf32>
    %c0_53 = arith.constant 0 : index
    %c0_54 = arith.constant 0 : index
    %29 = vector.load %arg5[%c0_53, %c0_54] : memref<1152x128xf32, #tpu.memory_space<vmem>>, vector<1152x128xf32>
    %cst_55 = arith.constant dense<0.000000e+00> : vector<64x128xf32>
    %30 = tpu.matmul %28, %29, %cst_55 {dimension_numbers = #tpu.dot_dimension_numbers<[1], [0], [0], [1], [0, 0, 1, 1], [], []>} : vector<64x1152xf32>, vector<1152x128xf32>, vector<64x128xf32> -> vector<64x128xf32>
    %c0_56 = arith.constant 0 : index
    %c0_57 = arith.constant 0 : index
    %31 = vector.load %arg6[%c0_56, %c0_57] : memref<1x128xf32, #tpu.memory_space<vmem>>, vector<1x128xf32>
    %32 = vector.broadcast %31 : vector<1x128xf32> to vector<64x128xf32>
    %33 = arith.addf %30, %32 : vector<64x128xf32>
    %34 = vector.shape_cast %33 : vector<64x128xf32> to vector<8x8x128xf32>
    %c0_58 = arith.constant 0 : index
    %c0_59 = arith.constant 0 : index
    %c0_60 = arith.constant 0 : index
    %c0_61 = arith.constant 0 : index
    %35 = vector.load %arg7[%c0_58, %c0_59, %c0_60, %c0_61] : memref<1x8x8x128xf32, #tpu.memory_space<vmem>>, vector<1x8x8x128xf32>
    %36 = vector.shape_cast %35 : vector<1x8x8x128xf32> to vector<8x8x128xf32>
    %37 = vector.shape_cast %34 : vector<8x8x128xf32> to vector<1x8x8x128xf32>
    tpu.vector_store %arg7[%c0_58, %c0_59, %c0_60, %c0_61], %37 {strides = array<i32>} : memref<1x8x8x128xf32, #tpu.memory_space<vmem>>, vector<1x8x8x128xf32>,
    %38 = arith.extui %0 : i1 to i32
    %c0_i32_62 = arith.constant 0 : i32
    %39 = arith.cmpi ne, %38, %c0_i32_62 : i32
    scf.if %39 {
      %cst_77 = arith.constant 0.000000e+00 : f32
      %57 = vector.broadcast %cst_77 : f32 to vector<1x8x128xf32>
      %c0_78 = arith.constant 0 : index
      %c0_79 = arith.constant 0 : index
      %c0_80 = arith.constant 0 : index
      %58 = vector.load %arg8[%c0_78, %c0_79, %c0_80] : memref<1x8x128xf32, #tpu.memory_space<vmem>>, vector<1x8x128xf32>
      tpu.vector_store %arg8[%c0_78, %c0_79, %c0_80], %57 {strides = array<i32>} : memref<1x8x128xf32, #tpu.memory_space<vmem>>, vector<1x8x128xf32>,
      %cst_81 = arith.constant 0.000000e+00 : f32
      %59 = vector.broadcast %cst_81 : f32 to vector<1x8x128xf32>
      %c0_82 = arith.constant 0 : index
      %c0_83 = arith.constant 0 : index
      %c0_84 = arith.constant 0 : index
      %60 = vector.load %arg9[%c0_82, %c0_83, %c0_84] : memref<1x8x128xf32, #tpu.memory_space<vmem>>, vector<1x8x128xf32>
      tpu.vector_store %arg9[%c0_82, %c0_83, %c0_84], %59 {strides = array<i32>} : memref<1x8x128xf32, #tpu.memory_space<vmem>>, vector<1x8x128xf32>,
    } else {
    }
    %cst_63 = arith.constant dense<0.000000e+00> : vector<128xf32>
    %40 = vector.multi_reduction <add>, %33, %cst_63 [0] : vector<64x128xf32> to vector<128xf32>
    %41 = vector.shape_cast %40 : vector<128xf32> to vector<1x128xf32>
    %42 = arith.mulf %33, %33 : vector<64x128xf32>
    %cst_64 = arith.constant dense<0.000000e+00> : vector<128xf32>
    %43 = vector.multi_reduction <add>, %42, %cst_64 [0] : vector<64x128xf32> to vector<128xf32>
    %44 = vector.shape_cast %43 : vector<128xf32> to vector<1x128xf32>
    %c0_65 = arith.constant 0 : index
    %c0_66 = arith.constant 0 : index
    %c0_67 = arith.constant 0 : index
    %45 = vector.load %arg8[%c0_65, %c0_66, %c0_67] : memref<1x8x128xf32, #tpu.memory_space<vmem>>, vector<1x8x128xf32>
    %46 = vector.shape_cast %41 : vector<1x128xf32> to vector<1x1x128xf32>
    %47 = vector.shape_cast %46 : vector<1x1x128xf32> to vector<1x1x128xf32>
    %48 = vector.broadcast %47 : vector<1x1x128xf32> to vector<1x8x128xf32>
    %49 = arith.addf %45, %48 : vector<1x8x128xf32>
    %c0_68 = arith.constant 0 : index
    %c0_69 = arith.constant 0 : index
    %c0_70 = arith.constant 0 : index
    %50 = vector.load %arg8[%c0_68, %c0_69, %c0_70] : memref<1x8x128xf32, #tpu.memory_space<vmem>>, vector<1x8x128xf32>
    tpu.vector_store %arg8[%c0_68, %c0_69, %c0_70], %49 {strides = array<i32>} : memref<1x8x128xf32, #tpu.memory_space<vmem>>, vector<1x8x128xf32>,
    %c0_71 = arith.constant 0 : index
    %c0_72 = arith.constant 0 : index
    %c0_73 = arith.constant 0 : index
    %51 = vector.load %arg9[%c0_71, %c0_72, %c0_73] : memref<1x8x128xf32, #tpu.memory_space<vmem>>, vector<1x8x128xf32>
    %52 = vector.shape_cast %44 : vector<1x128xf32> to vector<1x1x128xf32>
    %53 = vector.shape_cast %52 : vector<1x1x128xf32> to vector<1x1x128xf32>
    %54 = vector.broadcast %53 : vector<1x1x128xf32> to vector<1x8x128xf32>
    %55 = arith.addf %51, %54 : vector<1x8x128xf32>
    %c0_74 = arith.constant 0 : index
    %c0_75 = arith.constant 0 : index
    %c0_76 = arith.constant 0 : index
    %56 = vector.load %arg9[%c0_74, %c0_75, %c0_76] : memref<1x8x128xf32, #tpu.memory_space<vmem>>, vector<1x8x128xf32>
    tpu.vector_store %arg9[%c0_74, %c0_75, %c0_76], %55 {strides = array<i32>} : memref<1x8x128xf32, #tpu.memory_space<vmem>>, vector<1x8x128xf32>,
    return
  }
  func.func @transform_0(%arg0: i32, %arg1: i32) -> (i32, i32, i32, i32) {
    %c0_i32 = arith.constant 0 : i32
    %c0_i32_0 = arith.constant 0 : i32
    %c0_i32_1 = arith.constant 0 : i32
    return %arg0, %arg1, %c0_i32, %c0_i32_0 : i32, i32, i32, i32
  }
  func.func @transform_1(%arg0: i32, %arg1: i32) -> (i32, i32, i32, i32) {
    %c8_i32 = arith.constant 8 : i32
    %0 = arith.muli %arg1, %c8_i32 : i32
    %c1_i32 = arith.constant 1 : i32
    %1 = arith.subi %0, %c1_i32 : i32
    %c0_i32 = arith.constant 0 : i32
    %2 = arith.maxsi %1, %c0_i32 : i32
    %c0_i32_0 = arith.constant 0 : i32
    %c0_i32_1 = arith.constant 0 : i32
    %c0_i32_2 = arith.constant 0 : i32
    return %arg0, %2, %c0_i32_0, %c0_i32_1 : i32, i32, i32, i32
  }
  func.func @transform_2(%arg0: i32, %arg1: i32) -> (i32, i32, i32, i32) {
    %c1_i32 = arith.constant 1 : i32
    %0 = arith.addi %arg1, %c1_i32 : i32
    %c8_i32 = arith.constant 8 : i32
    %1 = arith.muli %0, %c8_i32 : i32
    %c7_i32 = arith.constant 7 : i32
    %2 = arith.minsi %1, %c7_i32 : i32
    %c0_i32 = arith.constant 0 : i32
    %c0_i32_0 = arith.constant 0 : i32
    %c0_i32_1 = arith.constant 0 : i32
    return %arg0, %2, %c0_i32, %c0_i32_0 : i32, i32, i32, i32
  }
  func.func @transform_3(%arg0: i32, %arg1: i32) -> (i32, i32) {
    %c0_i32 = arith.constant 0 : i32
    %c0_i32_0 = arith.constant 0 : i32
    %c0_i32_1 = arith.constant 0 : i32
    return %c0_i32, %c0_i32_0 : i32, i32
  }
  func.func @transform_4(%arg0: i32, %arg1: i32) -> (i32, i32) {
    %c0_i32 = arith.constant 0 : i32
    %c0_i32_0 = arith.constant 0 : i32
    %c0_i32_1 = arith.constant 0 : i32
    return %c0_i32, %c0_i32_0 : i32, i32
  }
  func.func @transform_5(%arg0: i32, %arg1: i32) -> (i32, i32, i32, i32) {
    %c0_i32 = arith.constant 0 : i32
    %c0_i32_0 = arith.constant 0 : i32
    %c0_i32_1 = arith.constant 0 : i32
    return %arg0, %arg1, %c0_i32, %c0_i32_0 : i32, i32, i32, i32
  }
  func.func @transform_6(%arg0: i32, %arg1: i32) -> (i32, i32, i32) {
    %c0_i32 = arith.constant 0 : i32
    %c0_i32_0 = arith.constant 0 : i32
    %c0_i32_1 = arith.constant 0 : i32
    return %arg0, %c0_i32, %c0_i32_0 : i32, i32, i32
  }
  func.func @transform_7(%arg0: i32, %arg1: i32) -> (i32, i32, i32) {
    %c0_i32 = arith.constant 0 : i32
    %c0_i32_0 = arith.constant 0 : i32
    %c0_i32_1 = arith.constant 0 : i32
    return %arg0, %c0_i32, %c0_i32_0 : i32, i32, i32
  }
}

</mosaic_0001>

<bundles_post_ra>
// kernel: tpu_custom_call.1
= control target key start
LH: loop header
LB: loop body
LE: loop exit
PB: predicated region body
PF: predicated region fallthrough
CT: control target
= control target key end

     0   :  { %s3044_s0 = inlined_call_operand.hbm [shape: f32[2,8,8,128], index: 0, kind: input, shape index: {}]   ;;  %s3045_s1 = inlined_call_operand.hbm [shape: f32[2,8,8,128], index: 1, kind: input, shape index: {}]   ;;  %s3046_s2 = inlined_call_operand.hbm [shape: f32[2,8,8,128], index: 2, kind: input, shape index: {}]   ;;  %s3047_s3 = inlined_call_operand.hbm [shape: f32[1152,128], index: 3, kind: input, shape index: {}]   ;;  %s3048_s4 = inlined_call_operand.vmem [shape: f32[1,128], index: 4, kind: input, shape index: {}]   ;;  %s3049_s5 = inlined_call_operand.hbm [shape: f32[2,8,8,128], index: 5, kind: output, shape index: {0}]   ;;  %s3050_s6 = inlined_call_operand.hbm [shape: f32[2,8,128], index: 6, kind: output, shape index: {1}]   ;;  %s3051_s7 = inlined_call_operand.hbm [shape: f32[2,8,128], index: 7, kind: output, shape index: {2}]  }
   0x1   :  { %3072 = sst [smem:[#allocation27_spill]] %s3045_s1 }
   0x2   :  { %3073 = sst [smem:[#allocation28_spill]] %s3050_s6 }
   0x3   :  { %3074 = sst [smem:[#allocation29_spill]] %s3051_s7 }
   0x4   :  { %13 = vsyncpa [#allocation4], 0 }
   0x5   :  { %15 = vsyncpa [#allocation4 + $0x1], 0 }
   0x6   :  { %16 = vsyncpa [#allocation7], 0 }
   0x7   :  { %18 = vsyncpa [#allocation7 + $0x1], 0 }
   0x8   :  { %19 = vsyncpa [#allocation10], 0 }
   0x9   :  { %20 = vsyncpa [#allocation5], 0 }
   0xa   :  { %22 = vsyncpa [#allocation5 + $0x1], 0 }
   0xb   :  { %23 = vsyncpa [#allocation13], 0 }
   0xc   :  { %25 = vsyncpa [#allocation13 + $0x1], 0  ;;  %s2495_s24 = smov 0   ;;  %s2497_s25 = smov 0  }
   0xd   :  { %s2499_s26 = smov 0   ;;  %s2501_s27 = smov 0  }
   0xe   :  { %s2503_s28 = smov 0   ;;  %s2505_s29 = smov 0  }
   0xf LB: > { %3075 = sst [smem:[#allocation20_spill]] %s2421_s24  ;;  %s43_s30 = sadd.s32 1, %s2437_s28  ;;  %s2441_s29 = sphi %s2505_s29, %s31_s29   ;;  %s2437_s28 = sphi %s2503_s28, %s3112_s28   ;;  %s2433_s27 = sphi %s2501_s27, %s3111_s27   ;;  %s2429_s26 = sphi %s2499_s26, %s3110_s26   ;;  %s2425_s25 = sphi %s2497_s25, %s3114_s25   ;;  %s2421_s24 = sphi %s2495_s24, %s3113_s24  }
  0x10   : > { %3076 = sst [smem:[#allocation21_spill]] %s2429_s26  ;;  %s52_s8 = sadd.s32 1, %s2429_s26 }
  0x11   : > { %3077 = sst [smem:[#allocation22_spill]] %s2437_s28  ;;  %p45_p0 = scmp.ge.s32.totalorder %s43_s30, 2 }
  0x12   : > { %3078 = sst [smem:[#allocation23_spill]] %s2441_s29  ;;  %p3053_p1 = scmp.ne.s32.totalorder %s2429_s26, %s2425_s25 }
  0x13   : > { %p60_p2 = scmp.eq.s32.totalorder %s2441_s29, 0  ;;  %s3116_s30 = smov (%p45_p0, %s43_s30), 0 }
  0x14   : > { %3079 = sst [smem:[#allocation24_spill]] %s3116_s30  ;;  %p2115_p5 = scmp.lt.s32.totalorder %s2441_s29, 2 }
  0x15   : > { %p61_p4 = por %p60_p2, %p3053_p1  ;;  %s47_s9 = ssub.s32 %s2437_s28, %s3116_s30 }
  0x16   : > { %s2540_s10 = sand.u32 1, %s2429_s26   ;;  %p50_p6 = scmp.eq.s32.totalorder %s47_s9, 0 }
  0x17   : > { %s2543_s11 = sshll.u32 %s2437_s28, 10  ;;  %p2551_p7 = pnand %p2115_p5, %p61_p4 }
  0x18   : > { %s2549_s14 = scalar_lea.hbm %s3044_s0, %s2543_s11  ;;  %s322_s17 = sand.u32 1, %s2441_s29  }
  0x19   : > { %s3080_s15 = scalar_select %p2551_p7, 1, 0 }
  0x1a   : > { %s2556_s16 = scalar_select %p50_p6, %s2429_s26, %s52_s8  }
  0x1b   : > { %s3052_s18 = sshll.u32 %s2540_s10, 3  ;;  %s3082_s1 = sld [smem:[#allocation27_spill]] }
  0x1c   : > { %3081 = sst [smem:[#allocation25_spill]] %s2556_s16  ;;  %s326_s22 = scalar_lea.vmem [#allocation6], %s3052_s18 }
  0x1d   : > { %s339_s23 = sshll.u32 %s326_s22, 4  ;;  %s2570_s9 = scalar_lea.sflag [#allocation7], %s322_s17  ;;  %s2568_s23 = int_to_ptr.vmem [resolvable:$true] %s339_s23 }
  0x1e   : > { %p2576_p9 = pneg %p2551_p7 }
  0x20   : > { %s3083_s12 = scalar_select %p2576_p9, 1, 0 }
  0x21   : > { %s2564_s21 = scalar_lea.hbm %s3082_s1, %s2543_s11  ;;  %s2178_s20 = scalar_lea.hbm %s3082_s1, 2048 }
  0x22   : > { %s2173_s8 = scalar_lea.hbm %s2564_s21, 128  ;;  %p2179_p12 = scmp.lt.u32.totalorder %s2564_s21, %s3082_s1 }
  0x23   : > { %p2174_p8 = scmp.ne.s32.totalorder %s2564_s21, %s2173_s8  ;;  %p2180_p13 = scmp.lt.u32.totalorder %s2178_s20, %s2173_s8 }
  0x24   : > { %p2182_p2 = scmp.lt.u32.totalorder %s2173_s8, %s2564_s21 }
  0x25   : > { %p2176_p10 = pnand %p2576_p9, %p2174_p8  ;;  %p2181_p0 = por %p2180_p13, %p2179_p12 }
  0x27   : > { %p2177_p11 = pneg %p2176_p10  ;;  %p2183_p4 = por %p2182_p2, %p2181_p0 }
  0x29   : > { %p2184_p5 = pnand %p2183_p4, %p2177_p11 }
  0x2b   : > { %2187 = shalt.err (!%p2184_p5)
}
  0x2c   : > { %s2188_s17 = scalar_lea.vmem %s2568_s23, 128  ;;  %s2443_s13 = smov [#allocation6]  }
  0x2d   : > { %p2189_p6 = scmp.ne.s32.totalorder %s2568_s23, %s2188_s17  ;;  %s2193_s19 = sshll.u32 %s2443_s13, 4  ;;  %s2194_s19 = int_to_ptr.vmem [resolvable:$false] %s2193_s19 }
  0x2e   : > { %s2195_s18 = scalar_lea.vmem %s2194_s19, 256  ;;  %p2196_p3 = scmp.lt.s32.totalorder %s2568_s23, %s2194_s19 }
  0x2f   : > { %p2191_p8 = pnand %p2189_p6, %p2576_p9  ;;  %p2197_p1 = scmp.lt.s32.totalorder %s2195_s18, %s2188_s17 }
  0x31   : > { %p2192_p10 = pneg %p2191_p8  ;;  %p2198_p12 = por %p2197_p1, %p2196_p3 }
  0x33   : > { %p2199_p13 = pnand %p2198_p12, %p2192_p10 }
  0x35   : > { %2202 = shalt.err (!%p2199_p13)
}
  0x36   : > { %2100 = dma.hbm_to_vmem [thread:$0]  (!%p2551_p7), %s2564_s21, 128, %s2568_s23, %s2570_s9  }
  0x37   : > { %s2601_s8 = sadd.s32 4294967295, %s2441_s29   ;;  %s3054_s20 = sadd.s32 4294967294, %s2441_s29  }
  0x38   : > { %p65_p1 = scmp.ne.s32.totalorder %s2425_s25, %s2421_s24  ;;  %p3063_p3 = scmp.eq.s32.totalorder %s2601_s8, 0 }
  0x39   : > { %p205_p11 = scmp.eq.s32.totalorder %s2601_s8, 1  ;;  %p211_p0 = scmp.eq.s32.totalorder %s3054_s20, 1 }
  0x3a   : > { %p1570_p2 = scmp.ge.s32.totalorder %s2441_s29, 1  ;;  %p2613_p4 = por %p3063_p3, %p65_p1 }
  0x3b   : > { %p3085_p5 = scmp.ne.s32.totalorder %s2429_s26, %s2425_s25  ;;  %p2624_p8 = por %p211_p0, %p65_p1 }
  0x3c   : > { %s3084_s22 = scalar_select %p2613_p4, 1, 0 }
  0x3d   : > { %p2620_p6 = por %p205_p11, %p3085_p5  ;;  %p270_p10 = scmp.lt.s32.totalorder %s2441_s29, 3 }
  0x3e   : > { %s3087_s23 = scalar_select %p2624_p8, 1, 0 }
  0x3f   : > { %s3086_s21 = scalar_select %p2620_p6, 1, 0 }
  0x40   : > { %3088 = sst [smem:[#allocation26_spill]] %s3087_s23  ;;  %p2629_p12 = pnand %p1570_p2, %p270_p10 }
  0x41   : > { %s2444_s13 = smov [#allocation9]   ;;  %s1573_s18 = sshll.u32 %s2540_s10, 6 }
  0x42   : > { %s3089_s17 = scalar_select %p2629_p12, 1, 0 }
  0x43   : > { %s282_s19 = sshll.u32 %s2444_s13, 4  ;;  %p2090_p13 = pneg %p2629_p12  ;;  %s2633_s19 = int_to_ptr.vmem [resolvable:$true] %s282_s19 }
  0x44   : > { %s303_s1 = scalar_lea.vmem [#allocation3], %s1573_s18  ;;  %s2203_s13 = scalar_lea.hbm %s3047_s3, 18432 }
  0x45   : > { %p2640_p11 = pnand %p2090_p13, %p3063_p3  ;;  %s312_s30 = sshll.u32 %s303_s1, 4  ;;  %s2645_s30 = int_to_ptr.vmem [resolvable:$true] %s312_s30 }
  0x46   : > { %p2204_p1 = scmp.ne.s32.totalorder %s3047_s3, %s2203_s13  ;;  %p2210_p10 = scmp.lt.u32.totalorder %s2203_s13, %s3047_s3 }
  0x47   : > { %p2205_p0 = pneg %p2640_p11 }
  0x49   : > { %p2206_p2 = pnand %p2205_p0, %p2204_p1 }
  0x4b   : > { %p2207_p5 = pneg %p2206_p2 }
  0x4d   : > { %p2212_p13 = pnand %p2210_p10, %p2207_p5 }
  0x4f   : > { %2215 = shalt.err (!%p2212_p13)
}
  0x50   : > { %s2216_s1 = scalar_lea.vmem %s2633_s19, 18432  ;;  %p2224_p4 = scmp.lt.s32.totalorder %s2633_s19, %s2633_s19 }
  0x51   : > { %p2217_p3 = scmp.ne.s32.totalorder %s2633_s19, %s2216_s1  ;;  %p2225_p12 = scmp.lt.s32.totalorder %s2216_s1, %s2216_s1 }
  0x53   : > { %p2219_p8 = pnand %p2217_p3, %p2205_p0  ;;  %p2226_p7 = por %p2225_p12, %p2224_p4 }
  0x55   : > { %p2220_p6 = pneg %p2219_p8 }
  0x57   : > { %p2227_p9 = pnand %p2226_p7, %p2220_p6 }
  0x59   : > { %2230 = shalt.err (!%p2227_p9)
}
  0x5a   : > { %s2445_s26 = smov 128   ;;  %s2446_s7 = smov 8  }
  0x5b   : > { %2093 = dma.hbm_to_vmem [thread:$0]  (!%p2640_p11), %s3047_s3, 18432, %s2633_s19, [#allocation10], %s2445_s26, %s2445_s26, %s2446_s7  }
  0x5c   : > { %s300_s16 = scalar_lea.sflag [#allocation4], %s2540_s10  ;;  %s2231_s23 = scalar_lea.hbm %s2549_s14, 1024 }
  0x5d   : > { %p2232_p7 = scmp.ne.s32.totalorder %s2549_s14, %s2231_s23  ;;  %p3091_p9 = scmp.ne.s32.totalorder %s3083_s12, 0 }
  0x5e   : > { %s2236_s1 = scalar_lea.hbm %s3044_s0, 2048  ;;  %p2237_p6 = scmp.lt.u32.totalorder %s2549_s14, %s3044_s0 }
  0x5f   : > { %p2234_p3 = pnand %p2232_p7, %p3091_p9  ;;  %p2238_p8 = scmp.lt.u32.totalorder %s2236_s1, %s2231_s23 }
  0x60   : > { %p2240_p1 = scmp.lt.u32.totalorder %s2231_s23, %s2549_s14 }
  0x61   : > { %p2235_p4 = pneg %p2234_p3  ;;  %p2239_p12 = por %p2238_p8, %p2237_p6 }
  0x63   : > { %p2241_p0 = por %p2240_p1, %p2239_p12 }
  0x65   : > { %p2242_p2 = pnand %p2241_p0, %p2235_p4 }
  0x67   : > { %2245 = shalt.err (!%p2242_p2)
}
  0x68   : > { %s2246_s20 = scalar_lea.vmem %s2645_s30, 1024  ;;  %s2447_s19 = smov [#allocation3]  }
  0x69   : > { %p2247_p11 = scmp.ne.s32.totalorder %s2645_s30, %s2246_s20  ;;  %s2251_s24 = sshll.u32 %s2447_s19, 4  ;;  %s2252_s24 = int_to_ptr.vmem [resolvable:$false] %s2251_s24 }
  0x6a   : > { %s2253_s6 = scalar_lea.vmem %s2252_s24, 2048  ;;  %p2254_p13 = scmp.lt.s32.totalorder %s2645_s30, %s2252_s24 }
  0x6b   : > { %p2249_p5 = pnand %p2247_p11, %p3091_p9  ;;  %p2255_p7 = scmp.lt.s32.totalorder %s2253_s6, %s2246_s20 }
  0x6d   : > { %p2250_p10 = pneg %p2249_p5  ;;  %p2256_p3 = por %p2255_p7, %p2254_p13 }
  0x6f   : > { %p2257_p6 = pnand %p2256_p3, %p2250_p10 }
  0x71   : > { %2260 = shalt.err (!%p2257_p6)
}
  0x72   : > { %p3092_p4 = scmp.ne.s32.totalorder %s3080_s15, 0  ;;  %s3093_s28 = sadd.s32 896, %s2543_s11 }
  0x73   : > { %s2703_s18 = scalar_lea.hbm %s3046_s2, %s3093_s28  ;;  %s3094_s13 = sshll.u32 %s2540_s10, 3 }
  0x74   : > { %2097 = dma.hbm_to_vmem [thread:$0]  (!%p3092_p4), %s2549_s14, 1024, %s2645_s30, %s300_s16, %s2445_s26, %s2445_s26, %s2446_s7  }
  0x75   : > { %s350_s1 = scalar_lea.vmem [#allocation8], %s3094_s13  ;;  %s2261_s19 = scalar_lea.hbm %s2703_s18, 128 }
  0x76   : > { %s363_s20 = sshll.u32 %s350_s1, 4  ;;  %p2262_p8 = scmp.ne.s32.totalorder %s2703_s18, %s2261_s19  ;;  %s364_s20 = int_to_ptr.vmem [resolvable:$true] %s363_s20 }
  0x77   : > { %s2266_s14 = scalar_lea.hbm %s3046_s2, 2048  ;;  %p2267_p0 = scmp.lt.u32.totalorder %s2703_s18, %s3046_s2 }
  0x78   : > { %p2264_p12 = pnand %p2262_p8, %p3091_p9  ;;  %p2268_p2 = scmp.lt.u32.totalorder %s2266_s14, %s2261_s19 }
  0x79   : > { %p2270_p5 = scmp.lt.u32.totalorder %s2261_s19, %s2703_s18 }
  0x7a   : > { %p2265_p1 = pneg %p2264_p12  ;;  %p2269_p11 = por %p2268_p2, %p2267_p0 }
  0x7c   : > { %p2271_p10 = por %p2270_p5, %p2269_p11 }
  0x7e   : > { %p2272_p13 = pnand %p2271_p10, %p2265_p1 }
  0x80   : > { %2275 = shalt.err (!%p2272_p13)
}
  0x81   : > { %s2276_s10 = scalar_lea.vmem %s364_s20, 128  ;;  %s2448_s16 = smov [#allocation8]  }
  0x82   : > { %p2277_p7 = scmp.ne.s32.totalorder %s364_s20, %s2276_s10  ;;  %s2281_s24 = sshll.u32 %s2448_s16, 4  ;;  %s2282_s24 = int_to_ptr.vmem [resolvable:$false] %s2281_s24 }
  0x83   : > { %s2283_s6 = scalar_lea.vmem %s2282_s24, 256  ;;  %p2284_p8 = scmp.lt.s32.totalorder %s364_s20, %s2282_s24 }
  0x84   : > { %p2279_p3 = pnand %p2277_p7, %p3091_p9  ;;  %p2285_p12 = scmp.lt.s32.totalorder %s2283_s6, %s2276_s10 }
  0x86   : > { %p2280_p6 = pneg %p2279_p3  ;;  %p2286_p4 = por %p2285_p12, %p2284_p8 }
  0x88   : > { %p2287_p0 = pnand %p2286_p4, %p2280_p6 }
  0x8a   : > { %2290 = shalt.err (!%p2287_p0)
}
  0x8b   : > { %p3095_p2 = scmp.ne.s32.totalorder %s3080_s15, 0  ;;  %p3096_p1 = scmp.ne.s32.totalorder %s3089_s17, 0 }
  0x8c   : > { %s2728_s12 = sand.u32 (!%p3096_p1), 1, %s2425_s25   ;;  %p3097_p9 = scmp.ne.s32.totalorder (!%p3096_p1), %s3084_s22, 0 }
  0x8d   : > { %2103 = dma.hbm_to_vmem [thread:$0]  (!%p3095_p2), %s2703_s18, 128, %s364_s20, %s2570_s9  }
  0x8e   : > { %372 = sbr.rel (%p3096_p1) target bundleno = 548 (0x224), region = 40  ;;  %s1583_s28 = sshll.u32 (!%p3096_p1), %s2728_s12, 6 }
  0x8f   : > { %s375_s29 = scalar_lea.sflag (!%p3096_p1), [#allocation4], %s2728_s12  ;;  %s2734_s23 = scalar_lea.vmem (!%p3096_p1), [#allocation3], %s1583_s28 }
  0x95   : > { %2400 = dma.done.wait (%p3097_p9), %s375_s29, 1024  }
  0x96   : > { %2402 = vsyncadd (%p3097_p9), %s375_s29, 4294966272  ;;  %s383_s15 = sand.u32 1, %s2601_s8  }
  0x97   : > { %s384_s9 = scalar_lea.sflag [#allocation7], %s383_s15 }
  0x98   : > { %2404 = dma.done.wait (%p3097_p9), %s384_s9, 256  }
  0x99   : > { %2406 = vsyncadd (%p3097_p9), %s384_s9, 4294967040  ;;  %p3098_p4 = scmp.eq.s32.totalorder %s2601_s8, 0 }
  0x9b   : > { %2408 = dma.done.wait (%p3098_p4), [#allocation10], 18432   ;;  %p3099_p11 = pmov %p3098_p4 }
  0x9c   : > { %v2449_v0 = vmov 0.0   ;;  %v598_v1 = vld [vmem:[#allocation9 + $0x80] sm:$0xff]  ;;  %v599_v2 = vld [vmem:[#allocation9 + $0x88] sm:$0xff]  ;;  %v600_v12 = vld [vmem:[#allocation9 + $0x90] sm:$0xff]  ;;  %s2902_s18 = scalar_lea.vmem [#allocation11], %s1583_s28  ;;  %s1604_s1 = sshll.u32 %s2433_s27, 10 }
  0x9d   : > { %2410 = vsyncadd (%p3099_p11), [#allocation10], 4294948864  ;;  %497 = vst [vmem:[#allocation2 + $0x1] sm:$0xff] %v2449_v0  ;;  %797 = vmatprep.mubr.f32.mxu0 %v2449_v0  ;;  %v630_v3 = vld [vmem:[#allocation9 + $0x180] sm:$0xff]  ;;  %v1898_v4 = vpack.c.bf16 %v599_v2, %v598_v1  ;;  %v631_v5 = vld [vmem:[#allocation9 + $0x188] sm:$0xff]  ;;  %s1337_s13 = sshll.u32 %s2902_s18, 4  ;;  %s2918_s30 = scalar_lea.hbm %s3049_s5, %s1604_s1  ;;  %s2912_s13 = int_to_ptr.vmem [resolvable:$true] %s1337_s13 }
  0x9e   : > { %477 = vst [vmem:[#allocation2] sm:$0x1] %v2449_v0  ;;  %478 = vst [vmem:[#allocation2 + $0x10] sm:$0x1] %v2449_v0  ;;  %v582_v6 = vld [vmem:[#allocation9] sm:$0xff]  ;;  %v583_v7 = vld [vmem:[#allocation9 + $0x8] sm:$0xff]  ;;  %v1930_v8 = vpack.c.bf16 %v631_v5, %v630_v3 }
  0x9f   : > { %479 = vst [vmem:[#allocation2 + $0x20] sm:$0x1] %v2449_v0  ;;  %480 = vst [vmem:[#allocation2 + $0x30] sm:$0x1] %v2449_v0  ;;  %v1900_v9 = vpack.c.bf16 %v583_v7, %v582_v6  ;;  %v614_v10 = vld [vmem:[#allocation9 + $0x100] sm:$0xff]  ;;  %v615_v11 = vld [vmem:[#allocation9 + $0x108] sm:$0xff]  ;;  %1899 = vmatprep.subr.bf16.mxu0 %v1898_v4 }
  0xa0   : > { %481 = vst [vmem:[#allocation2 + $0x40] sm:$0x1] %v2449_v0  ;;  %482 = vst [vmem:[#allocation2 + $0x50] sm:$0x1] %v2449_v0  ;;  %v1932_v13 = vpack.c.bf16 %v615_v11, %v614_v10  ;;  %v601_v14 = vld [vmem:[#allocation9 + $0x98] sm:$0xff]  ;;  %v632_v15 = vld [vmem:[#allocation9 + $0x190] sm:$0xff]  ;;  %1931 = vmatprep.subr.bf16.mxu1 %v1930_v8 }
  0xa1   : > { %483 = vst [vmem:[#allocation2 + $0x60] sm:$0x1] %v2449_v0  ;;  %484 = vst [vmem:[#allocation2 + $0x70] sm:$0x1] %v2449_v0  ;;  %v633_v16 = vld [vmem:[#allocation9 + $0x198] sm:$0xff]  ;;  %1901 = vmatpush3.bf16.msra.mxu0 %v1900_v9  ;;  %v1902_v17 = vpack.c.bf16 %v601_v14, %v600_v12  ;;  %v584_v19 = vld [vmem:[#allocation9 + $0x10] sm:$0xff] }
  0xa2   : > { %485 = vst [vmem:[#allocation2 + $0x80] sm:$0x1] %v2449_v0  ;;  %486 = vst [vmem:[#allocation2 + $0x90] sm:$0x1] %v2449_v0  ;;  %v1934_v18 = vpack.c.bf16 %v633_v16, %v632_v15  ;;  %v585_v20 = vld [vmem:[#allocation9 + $0x18] sm:$0xff]  ;;  %v616_v21 = vld [vmem:[#allocation9 + $0x110] sm:$0xff]  ;;  %1933 = vmatpush3.bf16.msra.mxu1 %v1932_v13 }
  0xa3   : > { %487 = vst [vmem:[#allocation2 + $0x9] sm:$0x1] %v2449_v0  ;;  %488 = vst [vmem:[#allocation2 + $0x19] sm:$0x1] %v2449_v0  ;;  %v1904_v22 = vpack.c.bf16 %v585_v20, %v584_v19  ;;  %v617_v23 = vld [vmem:[#allocation9 + $0x118] sm:$0xff]  ;;  %v602_v24 = vld [vmem:[#allocation9 + $0xa0] sm:$0xff]  ;;  %1903 = vmatprep.subr.bf16.mxu0 %v1902_v17 }
  0xa4   : > { %489 = vst [vmem:[#allocation2 + $0x29] sm:$0x1] %v2449_v0  ;;  %490 = vst [vmem:[#allocation2 + $0x39] sm:$0x1] %v2449_v0  ;;  %v603_v25 = vld [vmem:[#allocation9 + $0xa8] sm:$0xff]  ;;  %1935 = vmatprep.subr.bf16.mxu1 %v1934_v18  ;;  %v1936_v26 = vpack.c.bf16 %v617_v23, %v616_v21  ;;  %v634_v28 = vld [vmem:[#allocation9 + $0x1a0] sm:$0xff] }
  0xa5   : > { %491 = vst [vmem:[#allocation2 + $0x49] sm:$0x1] %v2449_v0  ;;  %492 = vst [vmem:[#allocation2 + $0x59] sm:$0x1] %v2449_v0  ;;  %v1906_v27 = vpack.c.bf16 %v603_v25, %v602_v24  ;;  %v635_v29 = vld [vmem:[#allocation9 + $0x1a8] sm:$0xff]  ;;  %v586_v30 = vld [vmem:[#allocation9 + $0x20] sm:$0xff]  ;;  %1905 = vmatpush3.bf16.msra.mxu0 %v1904_v22 }
  0xa6   : > { %493 = vst [vmem:[#allocation2 + $0x69] sm:$0x1] %v2449_v0  ;;  %494 = vst [vmem:[#allocation2 + $0x79] sm:$0x1] %v2449_v0  ;;  %v1938_v31 = vpack.c.bf16 %v635_v29, %v634_v28  ;;  %v587_v32 = vld [vmem:[#allocation9 + $0x28] sm:$0xff]  ;;  %v618_v33 = vld [vmem:[#allocation9 + $0x120] sm:$0xff]  ;;  %1937 = vmatpush3.bf16.msra.mxu1 %v1936_v26 }
  0xa7   : > { %495 = vst [vmem:[#allocation2 + $0x89] sm:$0x1] %v2449_v0  ;;  %496 = vst [vmem:[#allocation2 + $0x99] sm:$0x1] %v2449_v0  ;;  %v619_v34 = vld [vmem:[#allocation9 + $0x128] sm:$0xff]  ;;  %v1908_v35 = vpack.c.bf16 %v587_v32, %v586_v30  ;;  %v604_v36 = vld [vmem:[#allocation9 + $0xb0] sm:$0xff]  ;;  %1907 = vmatprep.subr.bf16.mxu0 %v1906_v27 }
  0xa8   : > { %508 = vst [vmem:[#allocation2 + $0x91] sm:$0xff] %v2449_v0  ;;  %v605_v37 = vld [vmem:[#allocation9 + $0xb8] sm:$0xff]  ;;  %v636_v38 = vld [vmem:[#allocation9 + $0x1b0] sm:$0xff]  ;;  %v1940_v39 = vpack.c.bf16 %v619_v34, %v618_v33  ;;  %1939 = vmatprep.subr.bf16.mxu1 %v1938_v31  ;;  %v606_v47 = vld [vmem:[#allocation9 + $0xc0] sm:$0xff]  ;;  %s1312_s11 = scalar_lea.sflag [#allocation5], %s2728_s12  ;;  %s2291_s14 = scalar_lea.vmem %s2912_s13, 1024 }
  0xa9   : > { %v1910_v40 = vpack.c.bf16 %v605_v37, %v604_v36  ;;  %v637_v41 = vld [vmem:[#allocation9 + $0x1b8] sm:$0xff]  ;;  %v588_v42 = vld [vmem:[#allocation9 + $0x30] sm:$0xff]  ;;  %v607_v48 = vld [vmem:[#allocation9 + $0xc8] sm:$0xff]  ;;  %1909 = vmatpush3.bf16.msra.mxu0 %v1908_v35  ;;  %p2292_p5 = scmp.ne.s32.totalorder %s2912_s13, %s2291_s14  ;;  %p3100_p10 = scmp.ne.s32.totalorder %s3086_s21, 0 }
  0xaa   : > { %v589_v43 = vld [vmem:[#allocation9 + $0x38] sm:$0xff]  ;;  %v1942_v44 = vpack.c.bf16 %v637_v41, %v636_v38  ;;  %v620_v45 = vld [vmem:[#allocation9 + $0x130] sm:$0xff]  ;;  %v638_v49 = vld [vmem:[#allocation9 + $0x1c0] sm:$0xff]  ;;  %1941 = vmatpush3.bf16.msra.mxu1 %v1940_v39  ;;  %v1914_v53 = vpack.c.bf16 %v607_v48, %v606_v47  ;;  %s2450_s26 = smov [#allocation11]  }
  0xab   : > { %v621_v46 = vld [vmem:[#allocation9 + $0x138] sm:$0xff]  ;;  %v639_v50 = vld [vmem:[#allocation9 + $0x1c8] sm:$0xff]  ;;  %v1912_v51 = vpack.c.bf16 %v589_v43, %v588_v42  ;;  %1911 = vmatprep.subr.bf16.mxu0 %v1910_v40  ;;  %v590_v54 = vld [vmem:[#allocation9 + $0x40] sm:$0xff]  ;;  %p2293_p13 = pnand %p2292_p5, %p3100_p10  ;;  %s2295_s7 = sshll.u32 %s2450_s26, 4  ;;  %s2296_s7 = int_to_ptr.vmem [resolvable:$false] %s2295_s7 }
  0xac   : > { %v1944_v52 = vpack.c.bf16 %v621_v46, %v620_v45  ;;  %v591_v55 = vld [vmem:[#allocation9 + $0x48] sm:$0xff]  ;;  %v622_v56 = vld [vmem:[#allocation9 + $0x140] sm:$0xff]  ;;  %1943 = vmatprep.subr.bf16.mxu1 %v1942_v44  ;;  %v1946_v57 = vpack.c.bf16 %v639_v50, %v638_v49  ;;  %v608_v59 = vld [vmem:[#allocation9 + $0xd0] sm:$0xff]  ;;  %s2297_s10 = scalar_lea.vmem %s2296_s7, 2048  ;;  %p2298_p3 = scmp.lt.s32.totalorder %s2912_s13, %s2296_s7 }
  0xad   : > { %v623_v58 = vld [vmem:[#allocation9 + $0x148] sm:$0xff]  ;;  %v609_v60 = vld [vmem:[#allocation9 + $0xd8] sm:$0xff]  ;;  %v640_v61 = vld [vmem:[#allocation9 + $0x1d0] sm:$0xff]  ;;  %1913 = vmatpush3.bf16.msra.mxu0 %v1912_v51  ;;  %v1916_v63 = vpack.c.bf16 %v591_v55, %v590_v54  ;;  %p2294_p7 = pneg %p2293_p13  ;;  %p2299_p6 = scmp.lt.s32.totalorder %s2297_s10, %s2291_s14 }
  0xae   : > { %v641_v62 = vld [vmem:[#allocation9 + $0x1d8] sm:$0xff]  ;;  %1945 = vmatpush3.bf16.msra.mxu1 %v1944_v52  ;;  %1915 = vmatprep.subr.bf16.mxu0 %v1914_v53  ;;  %v1948_v1 = vpack.c.bf16 %v623_v58, %v622_v56  ;;  %v1918_v2 = vpack.c.bf16 %v609_v60, %v608_v59  ;;  %v592_v3 = vld [vmem:[#allocation9 + $0x50] sm:$0xff]  ;;  %v610_v8 = vld [vmem:[#allocation9 + $0xe0] sm:$0xff] }
  0xaf   : > { %v593_v4 = vld [vmem:[#allocation9 + $0x58] sm:$0xff]  ;;  %v624_v5 = vld [vmem:[#allocation9 + $0x150] sm:$0xff]  ;;  %1947 = vmatprep.subr.bf16.mxu1 %v1946_v57  ;;  %v1950_v6 = vpack.c.bf16 %v641_v62, %v640_v61  ;;  %v611_v9 = vld [vmem:[#allocation9 + $0xe8] sm:$0xff]  ;;  %p2300_p8 = por %p2299_p6, %p2298_p3 }
  0xb0   : > { %v625_v7 = vld [vmem:[#allocation9 + $0x158] sm:$0xff]  ;;  %v642_v10 = vld [vmem:[#allocation9 + $0x1e0] sm:$0xff]  ;;  %v643_v11 = vld [vmem:[#allocation9 + $0x1e8] sm:$0xff]  ;;  %v1920_v12 = vpack.c.bf16 %v593_v4, %v592_v3  ;;  %v1922_v15 = vpack.c.bf16 %v611_v9, %v610_v8 }
  0xb1   : > { %1917 = vmatpush3.bf16.msra.mxu0 %v1916_v63  ;;  %v594_v13 = vld [vmem:[#allocation9 + $0x60] sm:$0xff]  ;;  %v1952_v14 = vpack.c.bf16 %v625_v7, %v624_v5  ;;  %v595_v16 = vld [vmem:[#allocation9 + $0x68] sm:$0xff]  ;;  %v1954_v19 = vpack.c.bf16 %v643_v11, %v642_v10  ;;  %v612_v21 = vld [vmem:[#allocation9 + $0xf0] sm:$0xff]  ;;  %p2301_p12 = pnand %p2300_p8, %p2294_p7 }
  0xb2   : > { %1949 = vmatpush3.bf16.msra.mxu1 %v1948_v1  ;;  %1919 = vmatprep.subr.bf16.mxu0 %v1918_v2  ;;  %v626_v17 = vld [vmem:[#allocation9 + $0x160] sm:$0xff]  ;;  %v627_v20 = vld [vmem:[#allocation9 + $0x168] sm:$0xff]  ;;  %v613_v22 = vld [vmem:[#allocation9 + $0xf8] sm:$0xff]  ;;  %v1924_v25 = vpack.c.bf16 %v595_v16, %v594_v13 }
  0xb3   : > { %v2775_v18 = vld [vmem:[%s2734_s23] sm:$0xff]  ;;  %1951 = vmatprep.subr.bf16.mxu1 %v1950_v6  ;;  %v644_v23 = vld [vmem:[#allocation9 + $0x1f0] sm:$0xff]  ;;  %v645_v24 = vld [vmem:[#allocation9 + $0x1f8] sm:$0xff]  ;;  %v1956_v27 = vpack.c.bf16 %v627_v20, %v626_v17  ;;  %v1926_v28 = vpack.c.bf16 %v613_v22, %v612_v21 }
  0xb4   : > { %499 = vst [vmem:[#allocation2 + $0x11] sm:$0xff] %v2775_v18  ;;  %v596_v26 = vld [vmem:[#allocation9 + $0x70] sm:$0xff]  ;;  %v597_v29 = vld [vmem:[#allocation9 + $0x78] sm:$0xff]  ;;  %v2779_v31 = vld [vmem:[%s2734_s23 + $0x8] sm:$0xff]  ;;  %v1958_v32 = vpack.c.bf16 %v645_v24, %v644_v23 }
  0xb5   : > { %1921 = vmatpush3.bf16.msra.mxu0 %v1920_v12  ;;  %v628_v30 = vld [vmem:[#allocation9 + $0x170] sm:$0xff]  ;;  %v629_v33 = vld [vmem:[#allocation9 + $0x178] sm:$0xff]  ;;  %v662_v34 = vld [vmem:[#allocation9 + $0x280] sm:$0xff]  ;;  %500 = vst [vmem:[#allocation2 + $0x21] sm:$0xff] %v2779_v31  ;;  %v1928_v38 = vpack.c.bf16 %v597_v29, %v596_v26 }
  0xb6   : > { %1953 = vmatpush3.bf16.msra.mxu1 %v1952_v14  ;;  %1923 = vmatprep.subr.bf16.mxu0 %v1922_v15  ;;  %v663_v35 = vld [vmem:[#allocation9 + $0x288] sm:$0xff]  ;;  %v694_v36 = vld [vmem:[#allocation9 + $0x380] sm:$0xff]  ;;  %v2783_v39 = vld [vmem:[%s2734_s23 + $0x10] sm:$0xff]  ;;  %v1960_v40 = vpack.c.bf16 %v629_v33, %v628_v30 }
  0xb7   : > { %1955 = vmatprep.subr.bf16.mxu1 %v1954_v19  ;;  %v695_v37 = vld [vmem:[#allocation9 + $0x388] sm:$0xff]  ;;  %v1962_v42 = vpack.c.bf16 %v663_v35, %v662_v34  ;;  %v646_v43 = vld [vmem:[#allocation9 + $0x200] sm:$0xff]  ;;  %501 = vst [vmem:[#allocation2 + $0x31] sm:$0xff] %v2783_v39  ;;  %v664_v48 = vld [vmem:[#allocation9 + $0x290] sm:$0xff] }
  0xb8   : > { %v647_v44 = vld [vmem:[#allocation9 + $0x208] sm:$0xff]  ;;  %v1994_v45 = vpack.c.bf16 %v695_v37, %v694_v36  ;;  %v678_v46 = vld [vmem:[#allocation9 + $0x300] sm:$0xff]  ;;  %v665_v49 = vld [vmem:[#allocation9 + $0x298] sm:$0xff] }
  0xb9   : > { %1925 = vmatpush3.bf16.msra.mxu0 %v1924_v25  ;;  %v679_v47 = vld [vmem:[#allocation9 + $0x308] sm:$0xff]  ;;  %v2787_v50 = vld [vmem:[%s2734_s23 + $0x18] sm:$0xff]  ;;  %v509_v51 = vld [vmem:[#allocation2] sm:$0xff]  ;;  %v1964_v52 = vpack.c.bf16 %v647_v44, %v646_v43  ;;  %v1966_v59 = vpack.c.bf16 %v665_v49, %v664_v48 }
  0xba   : > { %1957 = vmatpush3.bf16.msra.mxu1 %v1956_v27  ;;  %1927 = vmatprep.subr.bf16.mxu0 %v1926_v28  ;;  %v696_v53 = vld [vmem:[#allocation9 + $0x390] sm:$0xff]  ;;  %v697_v54 = vld [vmem:[#allocation9 + $0x398] sm:$0xff]  ;;  %502 = vst [vmem:[#allocation2 + $0x41] sm:$0xff] %v2787_v50  ;;  %v525_v55 = vld [vmem:[#allocation2 + $0x2] sm:$0xff]  ;;  %v1996_v56 = vpack.c.bf16 %v679_v47, %v678_v46 }
  0xbb   : > { %v533_v41 = vld [vmem:[#allocation2 + $0x10] sm:$0xff]  ;;  %1959 = vmatprep.subr.bf16.mxu1 %v1958_v32  ;;  %v649_v58 = vld [vmem:[#allocation9 + $0x218] sm:$0xff]  ;;  %v666_v62 = vld [vmem:[#allocation9 + $0x2a0] sm:$0xff]  ;;  %v1998_v1 = vpack.c.bf16 %v697_v54, %v696_v53 }
  0xbc   : > { %902 = vmatprep.mubr.f32.mxu1 %v533_v41  ;;  %v648_v57 = vld [vmem:[#allocation9 + $0x210] sm:$0xff]  ;;  %v681_v61 = vld [vmem:[#allocation9 + $0x318] sm:$0xff]  ;;  %v2790_v63 = vld [vmem:[#allocation2 + $0x20] sm:$0xff] }
  0xbd   : > { %1929 = vmatpush3.bf16.msra.mxu0 %v1928_v38  ;;  %v680_v60 = vld [vmem:[#allocation9 + $0x310] sm:$0xff]  ;;  %v667_v2 = vld [vmem:[#allocation9 + $0x2a8] sm:$0xff]  ;;  %v2793_v3 = vld [vmem:[%s2734_s23 + $0x20] sm:$0xff]  ;;  %v1968_v4 = vpack.c.bf16 %v649_v58, %v648_v57 }
  0xbe   : > { %1961 = vmatpush3.bf16.msra.mxu1 %v1960_v40  ;;  %1963 = vmatprep.subr.bf16.mxu0 %v1962_v42  ;;  %v698_v5 = vld [vmem:[#allocation9 + $0x3a0] sm:$0xff]  ;;  %v699_v6 = vld [vmem:[#allocation9 + $0x3a8] sm:$0xff]  ;;  %503 = vst [vmem:[#allocation2 + $0x51] sm:$0xff] %v2793_v3  ;;  %v2797_v7 = vld [vmem:[#allocation2 + $0x12] sm:$0xff]  ;;  %v2000_v8 = vpack.c.bf16 %v681_v61, %v680_v60  ;;  %v1970_v11 = vpack.c.bf16 %v667_v2, %v666_v62 }
  0xbf   : > { %1995 = vmatprep.subr.bf16.mxu1 %v1994_v45  ;;  %v650_v9 = vld [vmem:[#allocation9 + $0x220] sm:$0xff]  ;;  %v651_v10 = vld [vmem:[#allocation9 + $0x228] sm:$0xff]  ;;  %v668_v14 = vld [vmem:[#allocation9 + $0x2b0] sm:$0xff]  ;;  %v2002_v16 = vpack.c.bf16 %v699_v6, %v698_v5 }
  0xc0   : > { %798 = vmatmul.mubr.f32.vlgmr.msra.gmra.mrb[0].mxu0 %v509_v51  ;;  %v682_v12 = vld [vmem:[#allocation9 + $0x320] sm:$0xff]  ;;  %v683_v13 = vld [vmem:[#allocation9 + $0x328] sm:$0xff]  ;;  %v2800_v15 = vld [vmem:[#allocation2 + $0x30] sm:$0xff]  ;;  %v1972_v20 = vpack.c.bf16 %v651_v10, %v650_v9 }
  0xc1   : > { %903 = vmatmul.mubr.f32.vlgmr.msra.gmra.mrb[0].mxu1 %v525_v55  ;;  %1965 = vmatpush3.bf16.msra.mxu0 %v1964_v52  ;;  %v669_v17 = vld [vmem:[#allocation9 + $0x2b8] sm:$0xff]  ;;  %v2803_v19 = vld [vmem:[%s2734_s23 + $0x28] sm:$0xff]  ;;  %v700_v21 = vld [vmem:[#allocation9 + $0x3b0] sm:$0xff]  ;;  %v2004_v24 = vpack.c.bf16 %v683_v13, %v682_v12 }
  0xc2   : > { %1997 = vmatpush3.bf16.msra.mxu1 %v1996_v56  ;;  %802 = vmatprep.mubr.f32.mxu0 %v2775_v18  ;;  %v701_v22 = vld [vmem:[#allocation9 + $0x3b8] sm:$0xff]  ;;  %504 = vst [vmem:[#allocation2 + $0x61] sm:$0xff] %v2803_v19  ;;  %v2808_v23 = vld [vmem:[#allocation2 + $0x22] sm:$0xff]  ;;  %v652_v25 = vld [vmem:[#allocation9 + $0x230] sm:$0xff]  ;;  %v1974_v27 = vpack.c.bf16 %v669_v17, %v668_v14 }
  0xc3   : > { %907 = vmatprep.mubr.f32.mxu1 %v2790_v63  ;;  %1967 = vmatprep.subr.bf16.mxu0 %v1966_v59  ;;  %v653_v26 = vld [vmem:[#allocation9 + $0x238] sm:$0xff]  ;;  %v684_v28 = vld [vmem:[#allocation9 + $0x330] sm:$0xff]  ;;  %v2815_v32 = vld [vmem:[#allocation2 + $0x40] sm:$0xff]  ;;  %v2006_v33 = vpack.c.bf16 %v701_v22, %v700_v21 }
  0xc4   : > { %803 = vmatmul.mubr.f32.gmra.mrb[2].mxu0 %v533_v41  ;;  %1999 = vmatprep.subr.bf16.mxu1 %v1998_v1  ;;  %v685_v29 = vld [vmem:[#allocation9 + $0x338] sm:$0xff]  ;;  %v2812_v30 = vld [vmem:[%s2734_s23 + $0x30] sm:$0xff]  ;;  %v670_v34 = vld [vmem:[#allocation9 + $0x2c0] sm:$0xff]  ;;  %v1976_v36 = vpack.c.bf16 %v653_v26, %v652_v25 }
  0xc5   : > { %908 = vmatmul.mubr.f32.gmra.mrb[2].mxu1 %v2797_v7  ;;  %1969 = vmatpush3.bf16.msra.mxu0 %v1968_v4  ;;  %v671_v35 = vld [vmem:[#allocation9 + $0x2c8] sm:$0xff]  ;;  %505 = vst [vmem:[#allocation2 + $0x71] sm:$0xff] %v2812_v30  ;;  %v702_v37 = vld [vmem:[#allocation9 + $0x3c0] sm:$0xff]  ;;  %v2820_v40 = vld [vmem:[#allocation2 + $0x32] sm:$0xff]  ;;  %v2008_v41 = vpack.c.bf16 %v685_v29, %v684_v28 }
  0xc6   : > { %2001 = vmatpush3.bf16.msra.mxu1 %v2000_v8  ;;  %807 = vmatprep.mubr.f32.mxu0 %v2779_v31  ;;  %v703_v38 = vld [vmem:[#allocation9 + $0x3c8] sm:$0xff]  ;;  %v654_v42 = vld [vmem:[#allocation9 + $0x240] sm:$0xff]  ;;  %v1978_v44 = vpack.c.bf16 %v671_v35, %v670_v34  ;;  %v2824_v47 = vld [vmem:[%s2734_s23 + $0x38] sm:$0xff] }
  0xc7   : > { %912 = vmatprep.mubr.f32.mxu1 %v2800_v15  ;;  %1971 = vmatprep.subr.bf16.mxu0 %v1970_v11  ;;  %v655_v43 = vld [vmem:[#allocation9 + $0x248] sm:$0xff]  ;;  %v686_v45 = vld [vmem:[#allocation9 + $0x340] sm:$0xff]  ;;  %v2827_v48 = vld [vmem:[#allocation2 + $0x50] sm:$0xff]  ;;  %v2010_v49 = vpack.c.bf16 %v703_v38, %v702_v37  ;;  %506 = vst [vmem:[#allocation2 + $0x81] sm:$0xff] %v2824_v47 }
  0xc8   : > { %808 = vmatmul.mubr.f32.gmra.mrb[4].mxu0 %v2790_v63  ;;  %2003 = vmatprep.subr.bf16.mxu1 %v2002_v16  ;;  %v687_v46 = vld [vmem:[#allocation9 + $0x348] sm:$0xff]  ;;  %v672_v51 = vld [vmem:[#allocation9 + $0x2d0] sm:$0xff]  ;;  %v673_v52 = vld [vmem:[#allocation9 + $0x2d8] sm:$0xff]  ;;  %v1980_v53 = vpack.c.bf16 %v655_v43, %v654_v42 }
  0xc9   : > { %913 = vmatmul.mubr.f32.gmra.mrb[4].mxu1 %v2808_v23  ;;  %1973 = vmatpush3.bf16.msra.mxu0 %v1972_v20  ;;  %v704_v54 = vld [vmem:[#allocation9 + $0x3d0] sm:$0xff]  ;;  %v705_v55 = vld [vmem:[#allocation9 + $0x3d8] sm:$0xff]  ;;  %v2832_v56 = vld [vmem:[#allocation2 + $0x42] sm:$0xff]  ;;  %v2012_v57 = vpack.c.bf16 %v687_v46, %v686_v45  ;;  %v1982_v60 = vpack.c.bf16 %v673_v52, %v672_v51 }
  0xca   : > { %2005 = vmatpush3.bf16.msra.mxu1 %v2004_v24  ;;  %812 = vmatprep.mubr.f32.mxu0 %v2783_v39  ;;  %v656_v58 = vld [vmem:[#allocation9 + $0x250] sm:$0xff]  ;;  %v657_v59 = vld [vmem:[#allocation9 + $0x258] sm:$0xff]  ;;  %v2836_v1 = vld [vmem:[#allocation2 + $0x60] sm:$0xff]  ;;  %v2014_v2 = vpack.c.bf16 %v705_v55, %v704_v54 }
  0xcb   : > { %917 = vmatprep.mubr.f32.mxu1 %v2815_v32  ;;  %1975 = vmatprep.subr.bf16.mxu0 %v1974_v27  ;;  %v688_v61 = vld [vmem:[#allocation9 + $0x350] sm:$0xff]  ;;  %v689_v62 = vld [vmem:[#allocation9 + $0x358] sm:$0xff]  ;;  %v674_v4 = vld [vmem:[#allocation9 + $0x2e0] sm:$0xff]  ;;  %v1984_v6 = vpack.c.bf16 %v657_v59, %v656_v58 }
  0xcc   : > { %813 = vmatmul.mubr.f32.gmra.mrb[6].mxu0 %v2800_v15  ;;  %2007 = vmatprep.subr.bf16.mxu1 %v2006_v33  ;;  %v675_v5 = vld [vmem:[#allocation9 + $0x2e8] sm:$0xff]  ;;  %v706_v8 = vld [vmem:[#allocation9 + $0x3e0] sm:$0xff]  ;;  %v2840_v10 = vld [vmem:[#allocation2 + $0x52] sm:$0xff]  ;;  %v2016_v11 = vpack.c.bf16 %v689_v62, %v688_v61 }
  0xcd   : > { %918 = vmatmul.mubr.f32.gmra.mrb[6].mxu1 %v2820_v40  ;;  %1977 = vmatpush3.bf16.msra.mxu0 %v1976_v36  ;;  %v707_v9 = vld [vmem:[#allocation9 + $0x3e8] sm:$0xff]  ;;  %v658_v12 = vld [vmem:[#allocation9 + $0x260] sm:$0xff]  ;;  %v1986_v14 = vpack.c.bf16 %v675_v5, %v674_v4  ;;  %v2844_v20 = vld [vmem:[#allocation2 + $0x70] sm:$0xff] }
  0xce   : > { %2009 = vmatpush3.bf16.msra.mxu1 %v2008_v41  ;;  %817 = vmatprep.mubr.f32.mxu0 %v2787_v50  ;;  %v659_v13 = vld [vmem:[#allocation9 + $0x268] sm:$0xff]  ;;  %v690_v16 = vld [vmem:[#allocation9 + $0x360] sm:$0xff]  ;;  %v2018_v21 = vpack.c.bf16 %v707_v9, %v706_v8  ;;  %v676_v22 = vld [vmem:[#allocation9 + $0x2f0] sm:$0xff] }
  0xcf   : > { %922 = vmatprep.mubr.f32.mxu1 %v2827_v48  ;;  %1979 = vmatprep.subr.bf16.mxu0 %v1978_v44  ;;  %v691_v17 = vld [vmem:[#allocation9 + $0x368] sm:$0xff]  ;;  %v677_v24 = vld [vmem:[#allocation9 + $0x2f8] sm:$0xff]  ;;  %v1988_v25 = vpack.c.bf16 %v659_v13, %v658_v12  ;;  %v708_v26 = vld [vmem:[#allocation9 + $0x3f0] sm:$0xff] }
  0xd0   : > { %818 = vmatmul.mubr.f32.gmra.mrb[8].mxu0 %v2815_v32  ;;  %2011 = vmatprep.subr.bf16.mxu1 %v2010_v49  ;;  %v709_v27 = vld [vmem:[#allocation9 + $0x3f8] sm:$0xff]  ;;  %v2848_v28 = vld [vmem:[#allocation2 + $0x62] sm:$0xff]  ;;  %v2020_v29 = vpack.c.bf16 %v691_v17, %v690_v16  ;;  %v660_v33 = vld [vmem:[#allocation9 + $0x270] sm:$0xff]  ;;  %v1990_v35 = vpack.c.bf16 %v677_v24, %v676_v22 }
  0xd1   : > { %923 = vmatmul.mubr.f32.gmra.mrb[8].mxu1 %v2832_v56  ;;  %1981 = vmatpush3.bf16.msra.mxu0 %v1980_v53  ;;  %v661_v34 = vld [vmem:[#allocation9 + $0x278] sm:$0xff]  ;;  %v692_v36 = vld [vmem:[#allocation9 + $0x370] sm:$0xff]  ;;  %v2852_v38 = vld [vmem:[#allocation2 + $0x80] sm:$0xff]  ;;  %v2022_v41 = vpack.c.bf16 %v709_v27, %v708_v26 }
  0xd2   : > { %2013 = vmatpush3.bf16.msra.mxu1 %v2012_v57  ;;  %822 = vmatprep.mubr.f32.mxu0 %v2793_v3  ;;  %v693_v37 = vld [vmem:[#allocation9 + $0x378] sm:$0xff]  ;;  %v710_v42 = vld [vmem:[#allocation9 + $0x400] sm:$0xff]  ;;  %v711_v43 = vld [vmem:[#allocation9 + $0x408] sm:$0xff]  ;;  %v1992_v44 = vpack.c.bf16 %v661_v34, %v660_v33 }
  0xd3   : > { %927 = vmatprep.mubr.f32.mxu1 %v2836_v1  ;;  %1983 = vmatprep.subr.bf16.mxu0 %v1982_v60  ;;  %v2856_v45 = vld [vmem:[#allocation2 + $0x72] sm:$0xff]  ;;  %v2024_v46 = vpack.c.bf16 %v693_v37, %v692_v36  ;;  %v2026_v49 = vpack.c.bf16 %v711_v43, %v710_v42  ;;  %v714_v54 = vld [vmem:[#allocation9 + $0x420] sm:$0xff]  ;;  %v715_v55 = vld [vmem:[#allocation9 + $0x428] sm:$0xff] }
  0xd4   : > { %823 = vmatmul.mubr.f32.gmra.mrb[10].mxu0 %v2827_v48  ;;  %2015 = vmatprep.subr.bf16.mxu1 %v2014_v2  ;;  %v712_v51 = vld [vmem:[#allocation9 + $0x410] sm:$0xff]  ;;  %v713_v52 = vld [vmem:[#allocation9 + $0x418] sm:$0xff]  ;;  %v2034_v57 = vpack.c.bf16 %v715_v55, %v714_v54  ;;  %v719_v59 = vld [vmem:[#allocation9 + $0x448] sm:$0xff] }
  0xd5   : > { %928 = vmatmul.mubr.f32.gmra.mrb[10].mxu1 %v2840_v10  ;;  %1985 = vmatpush3.bf16.msra.mxu0 %v1984_v6  ;;  %v2030_v53 = vpack.c.bf16 %v713_v52, %v712_v51  ;;  %v717_v58 = vld [vmem:[#allocation9 + $0x438] sm:$0xff]  ;;  %v723_v61 = vld [vmem:[#allocation9 + $0x468] sm:$0xff] }
  0xd6   : > { %2017 = vmatpush3.bf16.msra.mxu1 %v2016_v11  ;;  %827 = vmatprep.mubr.f32.mxu0 %v2803_v19  ;;  %v721_v60 = vld [vmem:[#allocation9 + $0x458] sm:$0xff] }
  0xd7   : > { %932 = vmatprep.mubr.f32.mxu1 %v2844_v20  ;;  %1987 = vmatprep.subr.bf16.mxu0 %v1986_v14  ;;  %v725_v62 = vld [vmem:[#allocation9 + $0x478] sm:$0xff] }
  0xd8   : > { %828 = vmatmul.mubr.f32.gmra.mrb[12].mxu0 %v2836_v1  ;;  %2019 = vmatprep.subr.bf16.mxu1 %v2018_v21 }
  0xd9   : > { %933 = vmatmul.mubr.f32.gmra.mrb[12].mxu1 %v2848_v28  ;;  %1989 = vmatpush3.bf16.msra.mxu0 %v1988_v25 }
  0xda   : > { %2021 = vmatpush3.bf16.msra.mxu1 %v2020_v29  ;;  %832 = vmatprep.mubr.f32.mxu0 %v2812_v30 }
  0xdb   : > { %937 = vmatprep.mubr.f32.mxu1 %v2852_v38  ;;  %1991 = vmatprep.subr.bf16.mxu0 %v1990_v35 }
  0xdc   : > { %833 = vmatmul.mubr.f32.gmra.mrb[14].mxu0 %v2844_v20  ;;  %2023 = vmatprep.subr.bf16.mxu1 %v2022_v41 }
  0xdd   : > { %938 = vmatmul.mubr.f32.gmra.mrb[14].mxu1 %v2856_v45  ;;  %1993 = vmatpush3.bf16.msra.mxu0 %v1992_v44 }
  0xde   : > { %2025 = vmatpush3.bf16.msra.mxu1 %v2024_v46  ;;  %1007 = vmatprep.mubr.f32.mxu0 %v2797_v7  ;;  %v716_v7 = vld [vmem:[#allocation9 + $0x430] sm:$0xff] }
  0xdf   : > { %1112 = vmatprep.mubr.f32.mxu1 %v2779_v31  ;;  %2027 = vmatprep.subr.bf16.mxu0 %v2026_v49 }
  0xe0   : > { %1008 = vmatmul.mubr.f32.vlgmr.msra.gmra.mrb[16].mxu0 %v2775_v18  ;;  %2058 = vmatprep.subr.bf16.mxu1 %v2026_v49  ;;  %v2038_v18 = vpack.c.bf16 %v717_v58, %v716_v7 }
  0xe1   : > { %1113 = vmatmul.mubr.f32.vlgmr.msra.gmra.mrb[16].mxu1 %v2790_v63  ;;  %2029 = vmatpush3.bf16.msra.mxu0 %v2026_v49  ;;  %v718_v63 = vld [vmem:[#allocation9 + $0x440] sm:$0xff] }
  0xe2   : > { %2066 = vmatpush3.bf16.msra.mxu1 %v2026_v49  ;;  %1012 = vmatprep.mubr.f32.mxu0 %v2808_v23 }
  0xe3   : > { %1117 = vmatprep.mubr.f32.mxu1 %v2783_v39  ;;  %2031 = vmatprep.subr.bf16.mxu0 %v2030_v53 }
  0xe4   : > { %1013 = vmatmul.mubr.f32.gmra.mrb[18].mxu0 %v2779_v31  ;;  %2059 = vmatprep.subr.bf16.mxu1 %v2030_v53  ;;  %v2042_v31 = vpack.c.bf16 %v719_v59, %v718_v63 }
  0xe5   : > { %1118 = vmatmul.mubr.f32.gmra.mrb[18].mxu1 %v2800_v15  ;;  %2033 = vmatpush3.bf16.msra.mxu0 %v2030_v53  ;;  %v720_v15 = vld [vmem:[#allocation9 + $0x450] sm:$0xff] }
  0xe6   : > { %2067 = vmatpush3.bf16.msra.mxu1 %v2030_v53  ;;  %1017 = vmatprep.mubr.f32.mxu0 %v2820_v40 }
  0xe7   : > { %1122 = vmatprep.mubr.f32.mxu1 %v2787_v50  ;;  %2035 = vmatprep.subr.bf16.mxu0 %v2034_v57 }
  0xe8   : > { %1018 = vmatmul.mubr.f32.gmra.mrb[20].mxu0 %v2783_v39  ;;  %2060 = vmatprep.subr.bf16.mxu1 %v2034_v57  ;;  %v2046_v39 = vpack.c.bf16 %v721_v60, %v720_v15 }
  0xe9   : > { %1123 = vmatmul.mubr.f32.gmra.mrb[20].mxu1 %v2815_v32  ;;  %2037 = vmatpush3.bf16.msra.mxu0 %v2034_v57  ;;  %v722_v32 = vld [vmem:[#allocation9 + $0x460] sm:$0xff] }
  0xea   : > { %2068 = vmatpush3.bf16.msra.mxu1 %v2034_v57  ;;  %1022 = vmatprep.mubr.f32.mxu0 %v2832_v56 }
  0xeb   : > { %1127 = vmatprep.mubr.f32.mxu1 %v2793_v3  ;;  %2039 = vmatprep.subr.bf16.mxu0 %v2038_v18 }
  0xec   : > { %1023 = vmatmul.mubr.f32.gmra.mrb[22].mxu0 %v2787_v50  ;;  %2061 = vmatprep.subr.bf16.mxu1 %v2038_v18  ;;  %v2050_v50 = vpack.c.bf16 %v723_v61, %v722_v32 }
  0xed   : > { %1128 = vmatmul.mubr.f32.gmra.mrb[22].mxu1 %v2827_v48  ;;  %2041 = vmatpush3.bf16.msra.mxu0 %v2038_v18  ;;  %v724_v48 = vld [vmem:[#allocation9 + $0x470] sm:$0xff] }
  0xee   : > { %2069 = vmatpush3.bf16.msra.mxu1 %v2038_v18  ;;  %1027 = vmatprep.mubr.f32.mxu0 %v2840_v10 }
  0xef   : > { %1132 = vmatprep.mubr.f32.mxu1 %v2803_v19  ;;  %2043 = vmatprep.subr.bf16.mxu0 %v2042_v31 }
  0xf0   : > { %1028 = vmatmul.mubr.f32.gmra.mrb[24].mxu0 %v2793_v3  ;;  %2062 = vmatprep.subr.bf16.mxu1 %v2042_v31  ;;  %v556_v3 = vld [vmem:[#allocation2 + $0x82] sm:$0xff] }
  0xf1   : > { %1133 = vmatmul.mubr.f32.gmra.mrb[24].mxu1 %v2836_v1  ;;  %2045 = vmatpush3.bf16.msra.mxu0 %v2042_v31  ;;  %v2054_v1 = vpack.c.bf16 %v725_v62, %v724_v48 }
  0xf2   : > { %2070 = vmatpush3.bf16.msra.mxu1 %v2042_v31  ;;  %1032 = vmatprep.mubr.f32.mxu0 %v2848_v28 }
  0xf3   : > { %1137 = vmatprep.mubr.f32.mxu1 %v2812_v30  ;;  %2047 = vmatprep.subr.bf16.mxu0 %v2046_v39 }
  0xf4   : > { %1033 = vmatmul.mubr.f32.gmra.mrb[26].mxu0 %v2803_v19  ;;  %2063 = vmatprep.subr.bf16.mxu1 %v2046_v39  ;;  %v565_v19 = vld [vmem:[#allocation2 + $0x90] sm:$0xff] }
  0xf5   : > { %1138 = vmatmul.mubr.f32.gmra.mrb[26].mxu1 %v2844_v20  ;;  %2049 = vmatpush3.bf16.msra.mxu0 %v2046_v39 }
  0xf6   : > { %2071 = vmatpush3.bf16.msra.mxu1 %v2046_v39  ;;  %1037 = vmatprep.mubr.f32.mxu0 %v2856_v45 }
  0xf7   : > { %1142 = vmatprep.mubr.f32.mxu1 %v2824_v47  ;;  %2051 = vmatprep.subr.bf16.mxu0 %v2050_v50 }
  0xf8   : > { %1038 = vmatmul.mubr.f32.gmra.mrb[28].mxu0 %v2812_v30  ;;  %2064 = vmatprep.subr.bf16.mxu1 %v2050_v50  ;;  %v581_v30 = vld [vmem:[#allocation2 + $0x92] sm:$0xff] }
  0xf9   : > { %1143 = vmatmul.mubr.f32.gmra.mrb[28].mxu1 %v2852_v38  ;;  %2053 = vmatpush3.bf16.msra.mxu0 %v2050_v50 }
  0xfa   : > { %2072 = vmatpush3.bf16.msra.mxu1 %v2050_v50  ;;  %1042 = vmatprep.mubr.f32.mxu0 %v556_v3 }
  0xfb   : > { %1147 = vmatprep.mubr.f32.mxu1 %v2449_v0  ;;  %2055 = vmatprep.subr.bf16.mxu0 %v2054_v1 }
  0xfc   : > { %1043 = vmatmul.mubr.f32.gmra.mrb[30].mxu0 %v2824_v47  ;;  %2065 = vmatprep.subr.bf16.mxu1 %v2054_v1  ;;  %v1590_v47 = vld [vmem:[%s3048_s4] ss:$0 sm:$0xff] }
  0xfd   : > { %1148 = vmatmul.mubr.f32.gmra.mrb[30].mxu1 %v565_v19  ;;  %2057 = vmatpush3.bf16.msra.mxu0 %v2054_v1 }
  0xfe   : > { %2073 = vmatpush3.bf16.msra.mxu1 %v2054_v1  ;;  %1886 = vmatprep.mubr.f32.mxu0 %v2808_v23 }
  0xff   : > { %1892 = vmatprep.mubr.f32.mxu1 %v2848_v28 }
 0x100   : > { %1887 = vmatmul.mubr.f32.vlgmr.msra.gmra.mrb[32].mxu0 %v2820_v40 }
 0x101   : > { %1893 = vmatmul.mubr.f32.vlgmr.msra.gmra.mrb[32].mxu1 %v2856_v45  ;;  %1889 = vmatprep.mubr.f32.mxu0 %v2832_v56 }
 0x102   : > { %1895 = vmatprep.mubr.f32.mxu1 %v556_v3 }
 0x104   : > { %1890 = vmatmul.mubr.f32.gmra.mrb[34].mxu0 %v2840_v10 }
 0x105   : > { %1896 = vmatmul.mubr.f32.gmra.mrb[34].mxu1 %v581_v30 }
 0x193   : > { %v1638_v0 = vpop.f32.mrb[0].mxu0 }
 0x194   : > { %v1639_v2 = vpop.f32.mrb[1].mxu0  ;;  %v1694_v23 = vpop.f32.mrb[0].mxu1 }
 0x195   : > { %v1640_v4 = vadd.f32 %v1639_v2, %v1638_v0  ;;  %v1695_v5 = vpop.f32.mrb[1].mxu1 }
 0x196   : > { %v1696_v6 = vadd.f32 %v1695_v5, %v1694_v23 }
 0x197   : > { %v800_v40 = vadd.f32 %v1640_v4, %v1590_v47  ;;  %v1641_v8 = vpop.f32.mrb[2].mxu0 }
 0x198   : > { %v1642_v9 = vpop.f32.mrb[3].mxu0  ;;  %v1697_v11 = vpop.f32.mrb[2].mxu1 }
 0x199   : > { %v905_v56 = vadd.f32 %v1696_v6, %v800_v40  ;;  %v1643_v12 = vadd.f32 %v1642_v9, %v1641_v8  ;;  %v1698_v13 = vpop.f32.mrb[3].mxu1 }
 0x19a   : > { %v1699_v14 = vadd.f32 %v1698_v13, %v1697_v11 }
 0x19b   : > { %v805_v10 = vadd.f32 %v1643_v12, %v1590_v47  ;;  %v1644_v16 = vpop.f32.mrb[4].mxu0 }
 0x19c   : > { %v1645_v17 = vpop.f32.mrb[5].mxu0  ;;  %v1700_v20 = vpop.f32.mrb[4].mxu1 }
 0x19d   : > { %v910_v21 = vadd.f32 %v1699_v14, %v805_v10  ;;  %v1646_v22 = vadd.f32 %v1645_v17, %v1644_v16  ;;  %v1701_v24 = vpop.f32.mrb[5].mxu1 }
 0x19e   : > { %v1702_v25 = vadd.f32 %v1701_v24, %v1700_v20 }
 0x19f   : > { %v810_v26 = vadd.f32 %v1646_v22, %v1590_v47  ;;  %v1647_v27 = vpop.f32.mrb[6].mxu0 }
 0x1a0   : > { %v1648_v28 = vpop.f32.mrb[7].mxu0  ;;  %v1703_v29 = vpop.f32.mrb[6].mxu1 }
 0x1a1   : > { %v915_v33 = vadd.f32 %v1702_v25, %v810_v26  ;;  %v1649_v34 = vadd.f32 %v1648_v28, %v1647_v27  ;;  %v1704_v35 = vpop.f32.mrb[7].mxu1 }
 0x1a2   : > { %v1705_v36 = vadd.f32 %v1704_v35, %v1703_v29 }
 0x1a3   : > { %v815_v37 = vadd.f32 %v1649_v34, %v1590_v47  ;;  %v1650_v38 = vpop.f32.mrb[8].mxu0 }
 0x1a4   : > { %v1651_v41 = vpop.f32.mrb[9].mxu0  ;;  %v1706_v42 = vpop.f32.mrb[8].mxu1 }
 0x1a5   : > { %v920_v43 = vadd.f32 %v1705_v36, %v815_v37  ;;  %v1652_v44 = vadd.f32 %v1651_v41, %v1650_v38  ;;  %v1707_v45 = vpop.f32.mrb[9].mxu1 }
 0x1a6   : > { %v1708_v46 = vadd.f32 %v1707_v45, %v1706_v42 }
 0x1a7   : > { %v820_v49 = vadd.f32 %v1652_v44, %v1590_v47  ;;  %v1653_v51 = vpop.f32.mrb[10].mxu0 }
 0x1a8   : > { %v1654_v52 = vpop.f32.mrb[11].mxu0  ;;  %v1709_v53 = vpop.f32.mrb[10].mxu1 }
 0x1a9   : > { %v925_v54 = vadd.f32 %v1708_v46, %v820_v49  ;;  %v1655_v55 = vadd.f32 %v1654_v52, %v1653_v51  ;;  %v1710_v57 = vpop.f32.mrb[11].mxu1 }
 0x1aa   : > { %v1711_v7 = vadd.f32 %v1710_v57, %v1709_v53 }
 0x1ab   : > { %v825_v58 = vadd.f32 %v1655_v55, %v1590_v47  ;;  %v1656_v18 = vpop.f32.mrb[12].mxu0 }
 0x1ac   : > { %v1657_v63 = vpop.f32.mrb[13].mxu0  ;;  %v1712_v59 = vpop.f32.mrb[12].mxu1 }
 0x1ad   : > { %v930_v31 = vadd.f32 %v1711_v7, %v825_v58  ;;  %v1658_v15 = vadd.f32 %v1657_v63, %v1656_v18  ;;  %v1713_v60 = vpop.f32.mrb[13].mxu1 }
 0x1ae   : > { %v1714_v39 = vadd.f32 %v1713_v60, %v1712_v59 }
 0x1af   : > { %v830_v32 = vadd.f32 %v1658_v15, %v1590_v47  ;;  %v1659_v61 = vpop.f32.mrb[14].mxu0 }
 0x1b0   : > { %v1660_v50 = vpop.f32.mrb[15].mxu0  ;;  %v1715_v48 = vpop.f32.mrb[14].mxu1 }
 0x1b1   : > { %v935_v62 = vadd.f32 %v1714_v39, %v830_v32  ;;  %v1661_v3 = vadd.f32 %v1660_v50, %v1659_v61  ;;  %v1716_v1 = vpop.f32.mrb[15].mxu1 }
 0x1b2   : > { %v1717_v19 = vadd.f32 %v1716_v1, %v1715_v48 }
 0x1b3   : > { %v835_v30 = vadd.f32 %v1661_v3, %v1590_v47  ;;  %v1750_v0 = vpop.f32.mrb[16].mxu0 }
 0x1b4   : > { %v1751_v2 = vpop.f32.mrb[17].mxu0  ;;  %v1806_v23 = vpop.f32.mrb[16].mxu1 }
 0x1b5   : > { %v940_v4 = vadd.f32 %v1717_v19, %v835_v30  ;;  %v1752_v5 = vadd.f32 %v1751_v2, %v1750_v0  ;;  %v1807_v6 = vpop.f32.mrb[17].mxu1 }
 0x1b6   : > { %v1808_v40 = vadd.f32 %v1807_v6, %v1806_v23 }
 0x1b7   : > { %v1010_v8 = vadd.f32 %v1752_v5, %v905_v56  ;;  %v1753_v9 = vpop.f32.mrb[18].mxu0 }
 0x1b8   : > { %v1754_v11 = vpop.f32.mrb[19].mxu0  ;;  %v1809_v12 = vpop.f32.mrb[18].mxu1 }
 0x1b9   : > { %v1755_v13 = vadd.f32 %v1754_v11, %v1753_v9  ;;  %v1810_v14 = vpop.f32.mrb[19].mxu1  ;;  %v1115_v10 = vadd.f32 %v1808_v40, %v1010_v8 }
 0x1ba   : > { %v1811_v16 = vadd.f32 %v1810_v14, %v1809_v12 }
 0x1bb   : > { %v1015_v17 = vadd.f32 %v1755_v13, %v910_v21  ;;  %v1756_v20 = vpop.f32.mrb[20].mxu0 }
 0x1bc   : > { %v1757_v22 = vpop.f32.mrb[21].mxu0  ;;  %v1812_v24 = vpop.f32.mrb[20].mxu1 }
 0x1bd   : > { %v1758_v47 = vadd.f32 %v1757_v22, %v1756_v20  ;;  %v1813_v25 = vpop.f32.mrb[21].mxu1  ;;  %v1120_v26 = vadd.f32 %v1811_v16, %v1015_v17 }
 0x1be   : > { %v1814_v27 = vadd.f32 %v1813_v25, %v1812_v24 }
 0x1bf   : > { %v1020_v28 = vadd.f32 %v1758_v47, %v915_v33  ;;  %v1759_v29 = vpop.f32.mrb[22].mxu0 }
 0x1c0   : > { %v1760_v34 = vpop.f32.mrb[23].mxu0  ;;  %v1815_v35 = vpop.f32.mrb[22].mxu1 }
 0x1c1   : > { %v1761_v56 = vadd.f32 %v1760_v34, %v1759_v29  ;;  %v1816_v36 = vpop.f32.mrb[23].mxu1  ;;  %v1125_v37 = vadd.f32 %v1814_v27, %v1020_v28 }
 0x1c2   : > { %v1817_v38 = vadd.f32 %v1816_v36, %v1815_v35 }
 0x1c3   : > { %v1025_v41 = vadd.f32 %v1761_v56, %v920_v43  ;;  %v1762_v42 = vpop.f32.mrb[24].mxu0 }
 0x1c4   : > { %v1763_v44 = vpop.f32.mrb[25].mxu0  ;;  %v1818_v45 = vpop.f32.mrb[24].mxu1 }
 0x1c5   : > { %v1764_v21 = vadd.f32 %v1763_v44, %v1762_v42  ;;  %v1819_v46 = vpop.f32.mrb[25].mxu1  ;;  %v1130_v49 = vadd.f32 %v1817_v38, %v1025_v41 }
 0x1c6   : > { %v1820_v51 = vadd.f32 %v1819_v46, %v1818_v45 }
 0x1c7   : > { %v1030_v52 = vadd.f32 %v1764_v21, %v925_v54  ;;  %v1765_v53 = vpop.f32.mrb[26].mxu0 }
 0x1c8   : > { %v1766_v55 = vpop.f32.mrb[27].mxu0  ;;  %v1821_v57 = vpop.f32.mrb[26].mxu1 }
 0x1c9   : > { %v1767_v33 = vadd.f32 %v1766_v55, %v1765_v53  ;;  %v1822_v7 = vpop.f32.mrb[27].mxu1  ;;  %v1135_v58 = vadd.f32 %v1820_v51, %v1030_v52 }
 0x1ca   : > { %v1823_v18 = vadd.f32 %v1822_v7, %v1821_v57 }
 0x1cb   : > { %v1035_v63 = vadd.f32 %v1767_v33, %v930_v31  ;;  %v1768_v59 = vpop.f32.mrb[28].mxu0 }
 0x1cc   : > { %v1769_v15 = vpop.f32.mrb[29].mxu0  ;;  %v1824_v60 = vpop.f32.mrb[28].mxu1 }
 0x1cd   : > { %v1770_v43 = vadd.f32 %v1769_v15, %v1768_v59  ;;  %v1825_v39 = vpop.f32.mrb[29].mxu1  ;;  %v1140_v32 = vadd.f32 %v1823_v18, %v1035_v63 }
 0x1ce   : > { %v1826_v61 = vadd.f32 %v1825_v39, %v1824_v60 }
 0x1cf   : > { %v1040_v50 = vadd.f32 %v1770_v43, %v935_v62  ;;  %v1771_v48 = vpop.f32.mrb[30].mxu0 }
 0x1d0   : > { %v1772_v3 = vpop.f32.mrb[31].mxu0  ;;  %v1827_v54 = vpop.f32.mrb[30].mxu1 }
 0x1d1   : > { %v1773_v1 = vadd.f32 %v1772_v3, %v1771_v48  ;;  %v1828_v19 = vpop.f32.mrb[31].mxu1  ;;  %v1145_v30 = vadd.f32 %v1826_v61, %v1040_v50 }
 0x1d2   : > { %v1829_v0 = vadd.f32 %v1828_v19, %v1827_v54 }
 0x1d3   : > { %v1045_v2 = vadd.f32 %v1773_v1, %v940_v4  ;;  %v1888_v23 = vpop.f32.mrb[32].mxu0 }
 0x1d4   : > { %v1225_v31 = vadd.f32 %v1888_v23, %v1120_v26  ;;  %v1894_v5 = vpop.f32.mrb[32].mxu1  ;;  %v1219_v6 = vpop.f32.mrb[33].mxu0 }
 0x1d5   : > { %v2905_v62 = vadd.f32 %v1894_v5, %v1140_v32  ;;  %v1220_v40 = vadd.f32 %v1219_v6, %v1115_v10  ;;  %v1239_v8 = vpop.f32.mrb[33].mxu1  ;;  %v1150_v9 = vadd.f32 %v1829_v0, %v1045_v2 }
 0x1d6   : > { %1259 = vst [vmem:[%s2902_s18 + $0x8] sm:$0xff] %v1225_v31  ;;  %v1285_v4 = vmul.f32 %v1225_v31, %v1225_v31  ;;  %v1240_v11 = vadd.f32 %v1239_v8, %v1135_v58 }
 0x1d7   : > { %1263 = vst [vmem:[%s2902_s18 + $0x28] sm:$0xff] %v2905_v62  ;;  %1258 = vst [vmem:[%s2902_s18] sm:$0xff] %v1220_v40  ;;  %v1271_v12 = vadd.f32 %v1225_v31, %v1220_v40  ;;  %v1284_v13 = vmul.f32 %v1220_v40, %v1220_v40  ;;  %v1891_v14 = vpop.f32.mrb[34].mxu0 }
 0x1d8   : > { %1262 = vst [vmem:[%s2902_s18 + $0x20] sm:$0xff] %v1240_v11  ;;  %v1235_v10 = vadd.f32 %v1891_v14, %v1130_v49  ;;  %v1897_v16 = vpop.f32.mrb[34].mxu1  ;;  %v1229_v17 = vpop.f32.mrb[35].mxu0 }
 0x1d9   : > { %v1292_v20 = vadd.f32 %v1285_v4, %v1284_v13  ;;  %v1255_v22 = vadd.f32 %v1897_v16, %v1150_v9  ;;  %v1230_v24 = vadd.f32 %v1229_v17, %v1125_v37  ;;  %v1249_v47 = vpop.f32.mrb[35].mxu1 }
 0x1da   : > { %1261 = vst [vmem:[%s2902_s18 + $0x18] sm:$0xff] %v1235_v10  ;;  %v1250_v25 = vadd.f32 %v1249_v47, %v1145_v30  ;;  %v1287_v28 = vmul.f32 %v1235_v10, %v1235_v10 }
 0x1db   : > { %1265 = vst [vmem:[%s2902_s18 + $0x38] sm:$0xff] %v1255_v22  ;;  %1260 = vst [vmem:[%s2902_s18 + $0x10] sm:$0xff] %v1230_v24  ;;  %v1272_v26 = vadd.f32 %v1271_v12, %v1230_v24  ;;  %v1286_v27 = vmul.f32 %v1230_v24, %v1230_v24 }
 0x1dc   : > { %1264 = vst [vmem:[%s2902_s18 + $0x30] sm:$0xff] %v1250_v25 }
 0x1dd   : > { %v1273_v29 = vadd.f32 %v1272_v26, %v1235_v10  ;;  %v1293_v34 = vadd.f32 %v1292_v20, %v1286_v27 }
 0x1de   : > { %2304 = shalt.err (!%p2301_p12)
}
 0x1df   : > { %s2305_s16 = scalar_lea.hbm %s2918_s30, 1024  ;;  %s2309_s28 = scalar_lea.hbm %s3049_s5, 2048 }
 0x1e0   : > { %p2306_p0 = scmp.ne.s32.totalorder %s2918_s30, %s2305_s16  ;;  %p2310_p9 = scmp.lt.u32.totalorder %s2918_s30, %s3049_s5 }
 0x1e1   : > { %p2311_p4 = scmp.lt.u32.totalorder %s2309_s28, %s2305_s16  ;;  %p2313_p5 = scmp.lt.u32.totalorder %s2305_s16, %s2918_s30 }
 0x1e2   : > { %p2307_p2 = pnand %p2306_p0, %p3100_p10 }
 0x1e3   : > { %p2312_p11 = por %p2311_p4, %p2310_p9 }
 0x1e4   : > { %p2308_p1 = pneg %p2307_p2 }
 0x1e5   : > { %p2314_p13 = por %p2313_p5, %p2312_p11 }
 0x1e7   : > { %p2315_p7 = pnand %p2314_p13, %p2308_p1 }
 0x1e9   : > { %2318 = shalt.err (!%p2315_p7)
}
 0x1ea   : > { %s2451_s9 = smov 128   ;;  %s2452_s22 = smov 8   ;;  %v1288_v35 = vmul.f32 %v1240_v11, %v1240_v11  ;;  %v1294_v56 = vadd.f32 %v1293_v34, %v1287_v28  ;;  %v1274_v36 = vadd.f32 %v1273_v29, %v1240_v11  ;;  %v1289_v37 = vmul.f32 %v2905_v62, %v2905_v62  ;;  %v2172_v43 = vld [vmem:[#allocation2 + $0x1] sm:$0xff] }
 0x1eb   : > { %2084 = dma.vmem_to_hbm [thread:$0]  (%p3100_p10), %s2912_s13, 1024, %s2918_s30, %s1312_s11, %s2451_s9, %s2451_s9, %s2452_s22   ;;  %v1290_v44 = vmul.f32 %v1250_v25, %v1250_v25  ;;  %v1291_v21 = vmul.f32 %v1255_v22, %v1255_v22 }
 0x1ec   : > { %v1275_v38 = vadd.f32 %v1274_v36, %v2905_v62  ;;  %v1295_v41 = vadd.f32 %v1294_v56, %v1288_v35  ;;  %s1588_s17 = sshll.u32 %s2728_s12, 3  ;;  %s1596_s18 = sshll.u32 %s2433_s27, 7 }
 0x1ed   : > { %s443_s13 = scalar_lea.vmem [#allocation12], %s1588_s17  ;;  %s2953_s20 = scalar_lea.vmem [#allocation14], %s1588_s17 }
 0x1ee   : > { %v1276_v42 = vadd.f32 %v1275_v38, %v1250_v25  ;;  %v1296_v45 = vadd.f32 %v1295_v41, %v1289_v37  ;;  %s1353_s1 = sshll.u32 %s443_s13, 4  ;;  %s1366_s19 = sshll.u32 %s2953_s20, 4  ;;  %s2961_s1 = int_to_ptr.vmem [resolvable:$true] %s1353_s1  ;;  %s2968_s19 = int_to_ptr.vmem [resolvable:$true] %s1366_s19 }
 0x1ef   : > { %s3101_s11 = sld [smem:[#allocation28_spill]]  ;;  %s3102_s7 = sld [smem:[#allocation29_spill]] }
 0x1f0   : > { %v1277_v46 = vadd.f32 %v1276_v42, %v1255_v22  ;;  %v1297_v49 = vadd.f32 %v1296_v45, %v1290_v44  ;;  %s2972_s16 = scalar_lea.sflag [#allocation13], %s383_s15  ;;  %s2319_s24 = scalar_lea.vmem %s2961_s1, 128 }
 0x1f1   : > { %p2320_p3 = scmp.ne.s32.totalorder %s2961_s1, %s2319_s24  ;;  %s2453_s6 = smov [#allocation12]  }
 0x1f2   : > { %v1278_v51 = vrot.slane %v1277_v46, 4  ;;  %v1298_v52 = vadd.f32 %v1297_v49, %v1291_v21  ;;  %s2323_s28 = sshll.u32 %s2453_s6, 4  ;;  %s2324_s28 = int_to_ptr.vmem [resolvable:$false] %s2323_s28 }
 0x1f3   : > { %p2321_p6 = pnand %p2320_p3, %p3100_p10  ;;  %s2325_s29 = scalar_lea.vmem %s2324_s28, 256 }
 0x1f4   : > { %v1279_v53 = vadd.f32 %v1278_v51, %v1277_v46  ;;  %v1299_v55 = vrot.slane %v1298_v52, 4  ;;  %p2326_p12 = scmp.lt.s32.totalorder %s2961_s1, %s2324_s28  ;;  %p2327_p0 = scmp.lt.s32.totalorder %s2325_s29, %s2319_s24 }
 0x1f5   : > { %s2959_s14 = scalar_lea.hbm %s3101_s11, %s1596_s18  ;;  %s2966_s10 = scalar_lea.hbm %s3102_s7, %s1596_s18 }
 0x1f6   : > { %v1280_v57 = vrot.slane %v1279_v53, 2  ;;  %v1300_v33 = vadd.f32 %v1299_v55, %v1298_v52  ;;  %p2322_p8 = pneg %p2321_p6  ;;  %p2328_p2 = por %p2327_p0, %p2326_p12 }
 0x1f8   : > { %v1281_v7 = vadd.f32 %v1280_v57, %v1279_v53  ;;  %v1301_v58 = vrot.slane %v1300_v33, 2  ;;  %p2329_p1 = pnand %p2328_p2, %p2322_p8 }
 0x1fa   : > { %v1282_v18 = vrot.slane %v1281_v7, 1  ;;  %v1302_v63 = vadd.f32 %v1301_v58, %v1300_v33 }
 0x1fc   : > { %v1283_v59 = vadd.f32 %v1282_v18, %v1281_v7  ;;  %v1303_v15 = vrot.slane %v1302_v63, 1 }
 0x1fe   : > { %v1304_v60 = vadd.f32 %v1303_v15, %v1302_v63  ;;  %v1306_v39 = vadd.f32 %v2172_v43, %v1283_v59 }
 0x200   : > { %1307 = vst [vmem:[%s443_s13] sm:$0xff] %v1306_v39  ;;  %v1309_v32 = vadd.f32 %v2172_v43, %v1304_v60 }
 0x201   : > { %2332 = shalt.err (!%p2329_p1)
}
 0x202   : > { %s2333_s8 = scalar_lea.hbm %s2959_s14, 128  ;;  %s2337_s9 = scalar_lea.hbm %s3101_s11, 256 }
 0x203   : > { %p2334_p9 = scmp.ne.s32.totalorder %s2959_s14, %s2333_s8  ;;  %p2338_p5 = scmp.lt.u32.totalorder %s2959_s14, %s3101_s11 }
 0x204   : > { %p2339_p13 = scmp.lt.u32.totalorder %s2337_s9, %s2333_s8  ;;  %p2341_p3 = scmp.lt.u32.totalorder %s2333_s8, %s2959_s14 }
 0x205   : > { %p2335_p4 = pnand %p2334_p9, %p3100_p10 }
 0x206   : > { %p2340_p7 = por %p2339_p13, %p2338_p5 }
 0x207   : > { %p2336_p11 = pneg %p2335_p4 }
 0x208   : > { %p2342_p6 = por %p2341_p3, %p2340_p7 }
 0x20a   : > { %p2343_p8 = pnand %p2342_p6, %p2336_p11 }
 0x20c   : > { %2346 = shalt.err (!%p2343_p8)
}
 0x20d   : > { %2085 = dma.vmem_to_hbm [thread:$0]  (%p3100_p10), %s2961_s1, 128, %s2959_s14, %s2972_s16   ;;  %1310 = vst [vmem:[%s2953_s20] sm:$0xff] %v1309_v32 }
 0x20e   : > { %s2347_s18 = scalar_lea.vmem %s2968_s19, 128  ;;  %s2454_s13 = smov [#allocation14]  }
 0x20f   : > { %p2348_p12 = scmp.ne.s32.totalorder %s2968_s19, %s2347_s18  ;;  %s2351_s12 = sshll.u32 %s2454_s13, 4  ;;  %s2352_s12 = int_to_ptr.vmem [resolvable:$false] %s2351_s12 }
 0x210   : > { %s2353_s30 = scalar_lea.vmem %s2352_s12, 256  ;;  %p2354_p1 = scmp.lt.s32.totalorder %s2968_s19, %s2352_s12 }
 0x211   : > { %p2349_p0 = pnand %p2348_p12, %p3100_p10  ;;  %p2355_p9 = scmp.lt.s32.totalorder %s2353_s30, %s2347_s18 }
 0x213   : > { %p2350_p2 = pneg %p2349_p0  ;;  %p2356_p4 = por %p2355_p9, %p2354_p1 }
 0x215   : > { %p2357_p11 = pnand %p2356_p4, %p2350_p2 }
 0x217   : > { %2360 = shalt.err (!%p2357_p11)
}
 0x218   : > { %s2361_s1 = scalar_lea.hbm %s2966_s10, 128  ;;  %s2365_s27 = scalar_lea.hbm %s3102_s7, 256 }
 0x219   : > { %p2362_p5 = scmp.ne.s32.totalorder %s2966_s10, %s2361_s1  ;;  %p2366_p3 = scmp.lt.u32.totalorder %s2966_s10, %s3102_s7 }
 0x21a   : > { %p2367_p6 = scmp.lt.u32.totalorder %s2365_s27, %s2361_s1  ;;  %p2369_p12 = scmp.lt.u32.totalorder %s2361_s1, %s2966_s10 }
 0x21b   : > { %p2363_p13 = pnand %p2362_p5, %p3100_p10 }
 0x21c   : > { %p2368_p8 = por %p2367_p6, %p2366_p3 }
 0x21d   : > { %p2364_p7 = pneg %p2363_p13 }
 0x21e   : > { %p2370_p0 = por %p2369_p12, %p2368_p8 }
 0x220   : > { %p2371_p2 = pnand %p2370_p0, %p2364_p7 }
 0x222   : > { %2374 = shalt.err (!%p2371_p2)
}
 0x223   : > { %2086 = dma.vmem_to_hbm [thread:$0]  (%p3100_p10), %s2968_s19, 128, %s2966_s10, %s2972_s16  }
 0x224 PF: > { %s3103_s6 = sld [smem:[#allocation20_spill]]  ;;  %s3104_s28 = sld [smem:[#allocation26_spill]] }
 0x225   : > { %s3105_s29 = sld [smem:[#allocation23_spill]] }
 0x22a   : > { %s1378_s8 = sand.u32 1, %s3103_s6   ;;  %p3106_p1 = scmp.ne.s32.totalorder %s3104_s28, 0 }
 0x22b   : > { %p3107_p9 = scmp.ge.s32.totalorder %s3105_s29, 2  ;;  %s1379_s15 = scalar_lea.sflag [#allocation5], %s1378_s8 }
 0x22d   : > { %p2105_p4 = pnand %p3107_p9, %p3106_p1 }
 0x22f   : > { %2412 = dma.done.wait (!%p2105_p4), %s1379_s15, 1024  }
 0x230   : > { %2414 = vsyncadd (!%p2105_p4), %s1379_s15, 4294966272  ;;  %s3108_s23 = sadd.s32 4294967294, %s3105_s29  }
 0x231   : > { %s1387_s9 = sand.u32 1, %s3108_s23  }
 0x232   : > { %s1388_s22 = scalar_lea.sflag [#allocation13], %s1387_s9 }
 0x233   : > { %2416 = dma.done.wait (!%p2105_p4), %s1388_s22, 256  }
 0x234   : > { %2418 = vsyncadd (!%p2105_p4), %s1388_s22, 4294967040  ;;  %s31_s29 = sadd.s32 1, %s3105_s29   ;;  %s3109_s21 = sld [smem:[#allocation21_spill]] }
 0x235   : > { %p28_p10 = scmp.ge.s32.totalorder %s31_s29, 4   ;;  %s3110_s26 = sld [smem:[#allocation25_spill]] }
 0x236   : > { %s3111_s27 = sld [smem:[#allocation22_spill]]  ;;  %s3112_s28 = sld [smem:[#allocation24_spill]] }
 0x237   : > { %s3113_s24 = smov %s2425_s25  ;;  %30 = sbr.rel (!%p28_p10) target bundleno = 15 (0xf), region = 152 }
 0x23a   : > { %s3114_s25 = smov %s3109_s21 }
 0x23e   :  { %1402 = vsyncpa [#allocation4], 1 }
 0x23f   :  { %1404 = vsyncpa [#allocation4 + $0x1], 1 }
 0x240   :  { %1405 = vsyncpa [#allocation7], 1 }
 0x241   :  { %1407 = vsyncpa [#allocation7 + $0x1], 1 }
 0x242   :  { %1408 = vsyncpa [#allocation10], 1 }
 0x243   :  { %1409 = vsyncpa [#allocation5], 1 }
 0x244   :  { %1411 = vsyncpa [#allocation5 + $0x1], 1 }
 0x245   :  { %1412 = vsyncpa [#allocation13], 1 }
 0x246   :  { %1414 = vsyncpa [#allocation13 + $0x1], 1 }

</bundles_post_ra>
